<compile_context>
chip_gen: v5e
topology: v5e:2x2
jax: 0.10.0
libtpu: 0.0.40
codegen_flags: <defaults>
</compile_context>

<pallas_src>
import functools
import math

import jax
import jax.numpy as jnp
from jax.experimental import pallas as pl
from jax.experimental.pallas import tpu as pltpu

LANE = 128  # lane width; channel dims are padded to multiples of this


def _round_up(x, m):
    return ((x + m - 1) // m) * m


def _pad2(x, rows, cols):
    return jnp.pad(x, ((0, rows - x.shape[0]), (0, cols - x.shape[1])))


# ----------------------------- kernels ---------------------------------------


def _feature_matmul_kernel(x_ref, w_ref, o_ref):
    """One row-tile of x per grid step, full (small) W resident: o = x @ w."""
    o_ref[...] = jnp.dot(
        x_ref[...], w_ref[...], preferred_element_type=jnp.float32
    ).astype(o_ref.dtype)


def _aggregate_kernel(a_ref, z_ref, b_ref, o_ref, acc_ref, *, apply_relu):
    """o[i] = act(sum_k A[i,k] @ Z[k] + b).  f32 accumulate; bias/relu in f32."""
    k = pl.program_id(1)

    @pl.when(k == 0)
    def _init():
        acc_ref[...] = jnp.zeros_like(acc_ref)

    acc_ref[...] += jnp.dot(
        a_ref[...], z_ref[...], preferred_element_type=jnp.float32
    )

    @pl.when(k == pl.num_programs(1) - 1)
    def _finalize():
        r = acc_ref[...] + b_ref[...]
        if apply_relu:
            r = jnp.maximum(r, 0.0)
        o_ref[...] = r.astype(o_ref.dtype)


def _aggregate_project_kernel(a_ref, z_ref, b_ref, w_ref, o_ref, acc_ref):
    """Layer-1 aggregation fused with the head projection:

    o[i] = relu(sum_k A[i,k] @ Z[k] + b1) @ [Wmu | Wlogstd]

    The intermediate H = relu(A @ Z + b1) is never written back to HBM; the
    fused (small) weight W is VMEM-resident across the whole grid.
    """
    k = pl.program_id(1)

    @pl.when(k == 0)
    def _init():
        acc_ref[...] = jnp.zeros_like(acc_ref)

    acc_ref[...] += jnp.dot(
        a_ref[...], z_ref[...], preferred_element_type=jnp.float32
    )

    @pl.when(k == pl.num_programs(1) - 1)
    def _finalize():
        h = jnp.maximum(acc_ref[...] + b_ref[...], 0.0).astype(w_ref.dtype)
        o_ref[...] = jnp.dot(
            h, w_ref[...], preferred_element_type=jnp.float32
        ).astype(o_ref.dtype)


# ----------------------------- pallas_call wrappers ---------------------------


def _feature_matmul(x, w, *, tm, out_dtype=jnp.bfloat16):
    """x: [N_pad, Cin_pad] bf16, w: [Cin_pad, Cout_pad] bf16 -> [N_pad, Cout_pad]."""
    n_pad, cin_pad = x.shape
    cout_pad = w.shape[1]
    return pl.pallas_call(
        _feature_matmul_kernel,
        out_shape=jax.ShapeDtypeStruct((n_pad, cout_pad), out_dtype),
        grid_spec=pltpu.PrefetchScalarGridSpec(
            num_scalar_prefetch=0,
            grid=(n_pad // tm,),
            in_specs=[
                pl.BlockSpec((tm, cin_pad), lambda i: (i, 0)),
                pl.BlockSpec((cin_pad, cout_pad), lambda i: (0, 0)),
            ],
            out_specs=pl.BlockSpec((tm, cout_pad), lambda i: (i, 0)),
        ),
        compiler_params=pltpu.CompilerParams(
            dimension_semantics=("parallel",)
        ),
    )(x, w)


def _aggregate(a_p, z, b, *, apply_relu, out_dtype, tm, tk):
    """A_pad [N_pad, N_pad] bf16, Z [N_pad, C_pad] bf16, b [1, C_pad] f32."""
    n_pad = a_p.shape[0]
    c_pad = z.shape[1]
    flops = 2 * n_pad * n_pad * c_pad
    bytes_accessed = int(
        a_p.size * a_p.dtype.itemsize
        + z.size * z.dtype.itemsize
        + b.size * b.dtype.itemsize
        + n_pad * c_pad * jnp.dtype(out_dtype).itemsize
    )
    return pl.pallas_call(
        functools.partial(_aggregate_kernel, apply_relu=apply_relu),
        out_shape=jax.ShapeDtypeStruct((n_pad, c_pad), out_dtype),
        grid_spec=pltpu.PrefetchScalarGridSpec(
            num_scalar_prefetch=0,
            grid=(n_pad // tm, n_pad // tk),  # reduction axis (k) last
            in_specs=[
                pl.BlockSpec((tm, tk), lambda i, k: (i, k)),        # A tile
                pl.BlockSpec((tk, c_pad), lambda i, k: (k, 0)),     # Z k-slab
                pl.BlockSpec((1, c_pad), lambda i, k: (0, 0)),      # bias
            ],
            out_specs=pl.BlockSpec((tm, c_pad), lambda i, k: (i, 0)),
            scratch_shapes=[pltpu.VMEM((tm, c_pad), jnp.float32)],
        ),
        compiler_params=pltpu.CompilerParams(
            dimension_semantics=("parallel", "arbitrary")
        ),
        cost_estimate=pl.CostEstimate(
            flops=flops, transcendentals=0, bytes_accessed=bytes_accessed
        ),
    )(a_p, z, b)


def _aggregate_project(a_p, z, b, w, *, tm, tk, out_dtype=jnp.bfloat16):
    """relu(A_pad @ Z + b) @ W, fused.

    a_p [N_pad, N_pad] bf16, Z [N_pad, H_pad] bf16, b [1, H_pad] f32,
    w [H_pad, O_pad] bf16  ->  [N_pad, O_pad] out_dtype.
    """
    n_pad = a_p.shape[0]
    h_pad = z.shape[1]
    o_pad = w.shape[1]
    flops = 2 * n_pad * n_pad * h_pad + 2 * n_pad * h_pad * o_pad
    bytes_accessed = int(
        a_p.size * a_p.dtype.itemsize
        + z.size * z.dtype.itemsize
        + b.size * b.dtype.itemsize
        + w.size * w.dtype.itemsize
        + n_pad * o_pad * jnp.dtype(out_dtype).itemsize
    )
    return pl.pallas_call(
        _aggregate_project_kernel,
        out_shape=jax.ShapeDtypeStruct((n_pad, o_pad), out_dtype),
        grid_spec=pltpu.PrefetchScalarGridSpec(
            num_scalar_prefetch=0,
            grid=(n_pad // tm, n_pad // tk),  # reduction axis (k) last
            in_specs=[
                pl.BlockSpec((tm, tk), lambda i, k: (i, k)),        # A tile
                pl.BlockSpec((tk, h_pad), lambda i, k: (k, 0)),     # Z k-slab
                pl.BlockSpec((1, h_pad), lambda i, k: (0, 0)),      # bias b1
                pl.BlockSpec((h_pad, o_pad), lambda i, k: (0, 0)),  # fused W
            ],
            out_specs=pl.BlockSpec((tm, o_pad), lambda i, k: (i, 0)),
            scratch_shapes=[pltpu.VMEM((tm, h_pad), jnp.float32)],
        ),
        compiler_params=pltpu.CompilerParams(
            dimension_semantics=("parallel", "arbitrary")
        ),
        cost_estimate=pl.CostEstimate(
            flops=flops, transcendentals=0, bytes_accessed=bytes_accessed
        ),
    )(a_p, z, b, w)


# ----------------------------- model ------------------------------------------


def gcn_normalized_adjacency(edge_index, num_nodes):
    """Dense A_hat = D^{-1/2}(A + I)D^{-1/2}, matching GCNConv's gcn_norm."""
    src, dst = edge_index[0], edge_index[1]
    a = jnp.zeros((num_nodes, num_nodes), jnp.float32)
    # .add (not .set): duplicate edges accumulate, matching PyG's scatter-add.
    a = a.at[dst, src].add(1.0)
    a = a + jnp.eye(num_nodes, dtype=jnp.float32)  # self-loops
    deg = jnp.sum(a, axis=1)
    dinv = jnp.where(deg > 0, 1.0 / jnp.sqrt(deg), 0.0)
    return dinv[:, None] * a * dinv[None, :]


def variational_gcn_encoder(x, edge_index, params, *, tm=128, tk=128):
    """Forward pass.  x: [N, Cin] f32, edge_index: [2, E] int32.

    Returns (mu, logstd), each [N, out_channels] float32.
    Note: on v6e/v7x with large N, tm=tk=256 better fills the 256x256 MXU;
    128 is the safe default and fills the v5e MXU.
    """
    n, c_in = x.shape
    hidden = params["w1"].shape[1]
    out_c = params["w_mu"].shape[1]

    a_hat = gcn_normalized_adjacency(edge_index, n)

    # Head fusion: one weight/bias for [mu | logstd] -> single second A@ pass.
    w_cat = jnp.concatenate([params["w_mu"], params["w_logstd"]], axis=1)
    b_cat = jnp.concatenate([params["b_mu"], params["b_logstd"]], axis=1)

    # Lane-dense zero padding (channels -> 128 multiples, nodes -> tile grid).
    n_pad = _round_up(n, math.lcm(tm, tk))
    cin_pad = _round_up(c_in, LANE)
    h_pad = _round_up(hidden, LANE)
    o_pad = _round_up(2 * out_c, LANE)

    bf16 = jnp.bfloat16
    a_p = _pad2(a_hat, n_pad, n_pad).astype(bf16)            # MXU inputs in bf16
    x_p = _pad2(x, n_pad, cin_pad).astype(bf16)
    w1_p = _pad2(params["w1"], cin_pad, h_pad).astype(bf16)
    b1_p = _pad2(params["b1"], 1, h_pad)                      # biases stay f32
    wc_p = _pad2(w_cat, h_pad, o_pad).astype(bf16)
    bc_p = _pad2(b_cat, 1, o_pad)

    # Layer 1 feature transform:  XW1 = X @ W1         (one tiny row-tiled pass)
    xw1 = _feature_matmul(x_p, w1_p, tm=tm)                              # bf16
    # Layer 1 aggregation fused with head projection:
    #   HW = relu(A @ XW1 + b1) @ [Wmu | Wlogstd]      (H never hits HBM)
    hw = _aggregate_project(a_p, xw1, b1_p, wc_p, tm=tm, tk=tk)          # bf16
    # Layers 2+3 aggregation:  [mu | logstd] = A @ HW + [bmu | bls]
    out = _aggregate(a_p, hw, bc_p, apply_relu=False,
                     out_dtype=jnp.float32, tm=tm, tk=tk)

    mu = out[:n, :out_c]
    logstd = out[:n, out_c:2 * out_c]
    return mu, logstd


def init_params(key, in_channels, out_channels):
    """Deterministic glorot-uniform weights + zero biases (GCNConv defaults)."""
    hidden = 2 * out_channels

    def glorot(k, fan_in, fan_out):
        limit = jnp.sqrt(6.0 / (fan_in + fan_out))
        return jax.random.uniform(k, (fan_in, fan_out), jnp.float32, -limit, limit)

    k1, k2, k3 = jax.random.split(key, 3)
    return {
        "w1": glorot(k1, in_channels, hidden),
        "b1": jnp.zeros((1, hidden), jnp.float32),
        "w_mu": glorot(k2, hidden, out_channels),
        "b_mu": jnp.zeros((1, out_channels), jnp.float32),
        "w_logstd": glorot(k3, hidden, out_channels),
        "b_logstd": jnp.zeros((1, out_channels), jnp.float32),
    }


# ----------------------------- references -------------------------------------


def _reference_forward_f32(x, edge_index, params):
    """Pure-f32 JAX reference (module semantics)."""
    a = gcn_normalized_adjacency(edge_index, x.shape[0])
    h = jnp.maximum(a @ (x @ params["w1"]) + params["b1"], 0.0)
    mu = a @ (h @ params["w_mu"]) + params["b_mu"]
    ls = a @ (h @ params["w_logstd"]) + params["b_logstd"]
    return mu, ls


def _reference_forward_bf16(x, edge_index, params):
    """Reference mirroring the kernel numerics (bf16 MXU inputs, f32 accum)."""
    f32, bf16 = jnp.float32, jnp.bfloat16
    a = gcn_normalized_adjacency(edge_index, x.shape[0]).astype(bf16)
    w_cat = jnp.concatenate([params["w_mu"], params["w_logstd"]], axis=1).astype(bf16)
    b_cat = jnp.concatenate([params["b_mu"], params["b_logstd"]], axis=1)
    xw1 = jnp.dot(x.astype(bf16), params["w1"].astype(bf16),
                  preferred_element_type=f32).astype(bf16)
    h = jnp.maximum(jnp.dot(a, xw1, preferred_element_type=f32)
                    + params["b1"], 0.0).astype(bf16)
    hw = jnp.dot(h, w_cat, preferred_element_type=f32).astype(bf16)
    out = jnp.dot(a, hw, preferred_element_type=f32) + b_cat
    oc = params["w_mu"].shape[1]
    return out[:, :oc], out[:, oc:2 * oc]


if __name__ == "__main__":
    N = 200            # nodes (pads to 256 -> 2x2 tile grid, exercises pipeline)
    IN_CHANNELS = 8    # input feature dim
    OUT_CHANNELS = 20  # module's out_channels (hidden = 40)

    key = jax.random.PRNGKey(0)
    k_feat, k_param = jax.random.split(key)

    # deterministic node features
    x = jax.random.normal(k_feat, (N, IN_CHANNELS), dtype=jnp.float32)

    # deterministic undirected ring graph: i <-> (i+1) % N
    idx = jnp.arange(N, dtype=jnp.int32)
    nxt = (idx + 1) % N
    edge_index = jnp.stack(
        [jnp.concatenate([idx, nxt]), jnp.concatenate([nxt, idx])], axis=0
    )  # [2, 2N]

    params = init_params(k_param, IN_CHANNELS, OUT_CHANNELS)

    fwd = jax.jit(variational_gcn_encoder)
    mu, logstd = fwd(x, edge_index, params)
    jax.block_until_ready((mu, logstd))

    assert mu.shape == (N, OUT_CHANNELS) and logstd.shape == (N, OUT_CHANNELS)

    # Tight check vs a reference using the same bf16 MXU inputs / f32 accum.
    mu_b, ls_b = _reference_forward_bf16(x, edge_index, params)
    assert jnp.allclose(mu, mu_b, atol=2e-3, rtol=2e-3)
    assert jnp.allclose(logstd, ls_b, atol=2e-3, rtol=2e-3)

    # Looser sanity check vs the pure-f32 module semantics.
    mu_f, ls_f = _reference_forward_f32(x, edge_index, params)
    assert jnp.allclose(mu, mu_f, atol=5e-2, rtol=5e-2)
    assert jnp.allclose(logstd, ls_f, atol=5e-2, rtol=5e-2)

    print("KERNEL_OK")
</pallas_src>

<mosaic_0001>
module attributes {stable_mosaic.version = 11 : i64} {
  func.func @_feature_matmul_kernel(%arg0: i32, %arg1: memref<128x128xbf16, #tpu.memory_space<vmem>>, %arg2: memref<128x128xbf16, #tpu.memory_space<vmem>>, %arg3: memref<128x128xbf16, #tpu.memory_space<vmem>>) attributes {dimension_semantics = [#tpu.dimension_semantics<parallel>], iteration_bounds = array<i64: 2>, scalar_prefetch = 0 : i64, scratch_operands = 0 : i64, tpu.core_type = #tpu.core_type<tc>, window_params = [{transform_indices = @transform_0, window_bounds = array<i64: 128, 128>}, {pipeline_mode = #tpu.pipeline_mode<synchronous>, transform_indices = @transform_1, window_bounds = array<i64: 128, 128>}, {transform_indices = @transform_2, window_bounds = array<i64: 128, 128>}]} {
    %c0 = arith.constant 0 : index
    %c0_0 = arith.constant 0 : index
    %0 = vector.load %arg1[%c0, %c0_0] : memref<128x128xbf16, #tpu.memory_space<vmem>>, vector<128x128xbf16>
    %c0_1 = arith.constant 0 : index
    %c0_2 = arith.constant 0 : index
    %1 = vector.load %arg2[%c0_1, %c0_2] : memref<128x128xbf16, #tpu.memory_space<vmem>>, vector<128x128xbf16>
    %cst = arith.constant dense<0.000000e+00> : vector<128x128xf32>
    %2 = tpu.matmul %0, %1, %cst {dimension_numbers = #tpu.dot_dimension_numbers<[1], [0], [0], [1], [0, 0, 1, 1], [], []>} : vector<128x128xbf16>, vector<128x128xbf16>, vector<128x128xf32> -> vector<128x128xf32>
    %3 = arith.truncf %2 : vector<128x128xf32> to vector<128x128xbf16>
    %c0_3 = arith.constant 0 : index
    %c0_4 = arith.constant 0 : index
    %4 = vector.load %arg3[%c0_3, %c0_4] : memref<128x128xbf16, #tpu.memory_space<vmem>>, vector<128x128xbf16>
    tpu.vector_store %arg3[%c0_3, %c0_4], %3 {strides = array<i32>} : memref<128x128xbf16, #tpu.memory_space<vmem>>, vector<128x128xbf16>,
    return
  }
  func.func @transform_0(%arg0: i32) -> (i32, i32) {
    %c0_i32 = arith.constant 0 : i32
    %c0_i32_0 = arith.constant 0 : i32
    return %arg0, %c0_i32 : i32, i32
  }
  func.func @transform_1(%arg0: i32) -> (i32, i32) {
    %c0_i32 = arith.constant 0 : i32
    %c0_i32_0 = arith.constant 0 : i32
    %c0_i32_1 = arith.constant 0 : i32
    return %c0_i32, %c0_i32_0 : i32, i32
  }
  func.func @transform_2(%arg0: i32) -> (i32, i32) {
    %c0_i32 = arith.constant 0 : i32
    %c0_i32_0 = arith.constant 0 : i32
    return %arg0, %c0_i32 : i32, i32
  }
}

module attributes {stable_mosaic.version = 11 : i64} {
  func.func @_aggregate_project_kernel(%arg0: i32, %arg1: i32, %arg2: memref<128x128xbf16, #tpu.memory_space<vmem>>, %arg3: memref<128x128xbf16, #tpu.memory_space<vmem>>, %arg4: memref<1x128xf32, #tpu.memory_space<vmem>>, %arg5: memref<128x128xbf16, #tpu.memory_space<vmem>>, %arg6: memref<128x128xbf16, #tpu.memory_space<vmem>>, %arg7: memref<128x128xf32, #tpu.memory_space<vmem>>) attributes {dimension_semantics = [#tpu.dimension_semantics<parallel>, #tpu.dimension_semantics<arbitrary>], iteration_bounds = array<i64: 2, 2>, scalar_prefetch = 0 : i64, scratch_operands = 1 : i64, tpu.core_type = #tpu.core_type<tc>, window_params = [{transform_indices = @transform_0, window_bounds = array<i64: 128, 128>}, {transform_indices = @transform_1, window_bounds = array<i64: 128, 128>}, {pipeline_mode = #tpu.pipeline_mode<synchronous>, transform_indices = @transform_2, window_bounds = array<i64: 1, 128>}, {pipeline_mode = #tpu.pipeline_mode<synchronous>, transform_indices = @transform_3, window_bounds = array<i64: 128, 128>}, {transform_indices = @transform_4, window_bounds = array<i64: 128, 128>}]} {
    %c0_i32 = arith.constant 0 : i32
    %0 = arith.cmpi eq, %arg1, %c0_i32 : i32
    %1 = arith.extui %0 : i1 to i32
    %c0_i32_0 = arith.constant 0 : i32
    %2 = arith.cmpi ne, %1, %c0_i32_0 : i32
    scf.if %2 {
      %cst_9 = arith.constant 0.000000e+00 : f32
      %12 = vector.broadcast %cst_9 : f32 to vector<128x128xf32>
      %c0_10 = arith.constant 0 : index
      %c0_11 = arith.constant 0 : index
      %13 = vector.load %arg7[%c0_10, %c0_11] : memref<128x128xf32, #tpu.memory_space<vmem>>, vector<128x128xf32>
      tpu.vector_store %arg7[%c0_10, %c0_11], %12 {strides = array<i32>} : memref<128x128xf32, #tpu.memory_space<vmem>>, vector<128x128xf32>,
    } else {
    }
    %c0 = arith.constant 0 : index
    %c0_1 = arith.constant 0 : index
    %3 = vector.load %arg7[%c0, %c0_1] : memref<128x128xf32, #tpu.memory_space<vmem>>, vector<128x128xf32>
    %c0_2 = arith.constant 0 : index
    %c0_3 = arith.constant 0 : index
    %4 = vector.load %arg2[%c0_2, %c0_3] : memref<128x128xbf16, #tpu.memory_space<vmem>>, vector<128x128xbf16>
    %c0_4 = arith.constant 0 : index
    %c0_5 = arith.constant 0 : index
    %5 = vector.load %arg3[%c0_4, %c0_5] : memref<128x128xbf16, #tpu.memory_space<vmem>>, vector<128x128xbf16>
    %cst = arith.constant dense<0.000000e+00> : vector<128x128xf32>
    %6 = tpu.matmul %4, %5, %cst {dimension_numbers = #tpu.dot_dimension_numbers<[1], [0], [0], [1], [0, 0, 1, 1], [], []>} : vector<128x128xbf16>, vector<128x128xbf16>, vector<128x128xf32> -> vector<128x128xf32>
    %7 = arith.addf %3, %6 : vector<128x128xf32>
    %c0_6 = arith.constant 0 : index
    %c0_7 = arith.constant 0 : index
    %8 = vector.load %arg7[%c0_6, %c0_7] : memref<128x128xf32, #tpu.memory_space<vmem>>, vector<128x128xf32>
    tpu.vector_store %arg7[%c0_6, %c0_7], %7 {strides = array<i32>} : memref<128x128xf32, #tpu.memory_space<vmem>>, vector<128x128xf32>,
    %c1_i32 = arith.constant 1 : i32
    %9 = arith.cmpi eq, %arg1, %c1_i32 : i32
    %10 = arith.extui %9 : i1 to i32
    %c0_i32_8 = arith.constant 0 : i32
    %11 = arith.cmpi ne, %10, %c0_i32_8 : i32
    scf.if %11 {
      %c0_9 = arith.constant 0 : index
      %c0_10 = arith.constant 0 : index
      %12 = vector.load %arg7[%c0_9, %c0_10] : memref<128x128xf32, #tpu.memory_space<vmem>>, vector<128x128xf32>
      %c0_11 = arith.constant 0 : index
      %c0_12 = arith.constant 0 : index
      %13 = vector.load %arg4[%c0_11, %c0_12] : memref<1x128xf32, #tpu.memory_space<vmem>>, vector<1x128xf32>
      %14 = vector.broadcast %13 : vector<1x128xf32> to vector<128x128xf32>
      %15 = arith.addf %12, %14 : vector<128x128xf32>
      %cst_13 = arith.constant 0.000000e+00 : f32
      %16 = vector.broadcast %cst_13 : f32 to vector<128x128xf32>
      %17 = arith.maximumf %15, %16 : vector<128x128xf32>
      %18 = arith.truncf %17 : vector<128x128xf32> to vector<128x128xbf16>
      %c0_14 = arith.constant 0 : index
      %c0_15 = arith.constant 0 : index
      %19 = vector.load %arg5[%c0_14, %c0_15] : memref<128x128xbf16, #tpu.memory_space<vmem>>, vector<128x128xbf16>
      %cst_16 = arith.constant dense<0.000000e+00> : vector<128x128xf32>
      %20 = tpu.matmul %18, %19, %cst_16 {dimension_numbers = #tpu.dot_dimension_numbers<[1], [0], [0], [1], [0, 0, 1, 1], [], []>} : vector<128x128xbf16>, vector<128x128xbf16>, vector<128x128xf32> -> vector<128x128xf32>
      %21 = arith.truncf %20 : vector<128x128xf32> to vector<128x128xbf16>
      %c0_17 = arith.constant 0 : index
      %c0_18 = arith.constant 0 : index
      %22 = vector.load %arg6[%c0_17, %c0_18] : memref<128x128xbf16, #tpu.memory_space<vmem>>, vector<128x128xbf16>
      tpu.vector_store %arg6[%c0_17, %c0_18], %21 {strides = array<i32>} : memref<128x128xbf16, #tpu.memory_space<vmem>>, vector<128x128xbf16>,
    } else {
    }
    return
  }
  func.func @transform_0(%arg0: i32, %arg1: i32) -> (i32, i32) {
    %c0_i32 = arith.constant 0 : i32
    return %arg0, %arg1 : i32, i32
  }
  func.func @transform_1(%arg0: i32, %arg1: i32) -> (i32, i32) {
    %c0_i32 = arith.constant 0 : i32
    %c0_i32_0 = arith.constant 0 : i32
    return %arg1, %c0_i32 : i32, i32
  }
  func.func @transform_2(%arg0: i32, %arg1: i32) -> (i32, i32) {
    %c0_i32 = arith.constant 0 : i32
    %c0_i32_0 = arith.constant 0 : i32
    %c0_i32_1 = arith.constant 0 : i32
    return %c0_i32, %c0_i32_0 : i32, i32
  }
  func.func @transform_3(%arg0: i32, %arg1: i32) -> (i32, i32) {
    %c0_i32 = arith.constant 0 : i32
    %c0_i32_0 = arith.constant 0 : i32
    %c0_i32_1 = arith.constant 0 : i32
    return %c0_i32, %c0_i32_0 : i32, i32
  }
  func.func @transform_4(%arg0: i32, %arg1: i32) -> (i32, i32) {
    %c0_i32 = arith.constant 0 : i32
    %c0_i32_0 = arith.constant 0 : i32
    return %arg0, %c0_i32 : i32, i32
  }
}

module attributes {stable_mosaic.version = 11 : i64} {
  func.func @_aggregate_kernel(%arg0: i32, %arg1: i32, %arg2: memref<128x128xbf16, #tpu.memory_space<vmem>>, %arg3: memref<128x128xbf16, #tpu.memory_space<vmem>>, %arg4: memref<1x128xf32, #tpu.memory_space<vmem>>, %arg5: memref<128x128xf32, #tpu.memory_space<vmem>>, %arg6: memref<128x128xf32, #tpu.memory_space<vmem>>) attributes {dimension_semantics = [#tpu.dimension_semantics<parallel>, #tpu.dimension_semantics<arbitrary>], iteration_bounds = array<i64: 2, 2>, scalar_prefetch = 0 : i64, scratch_operands = 1 : i64, tpu.core_type = #tpu.core_type<tc>, window_params = [{transform_indices = @transform_0, window_bounds = array<i64: 128, 128>}, {transform_indices = @transform_1, window_bounds = array<i64: 128, 128>}, {pipeline_mode = #tpu.pipeline_mode<synchronous>, transform_indices = @transform_2, window_bounds = array<i64: 1, 128>}, {transform_indices = @transform_3, window_bounds = array<i64: 128, 128>}]} {
    %c0_i32 = arith.constant 0 : i32
    %0 = arith.cmpi eq, %arg1, %c0_i32 : i32
    %1 = arith.extui %0 : i1 to i32
    %c0_i32_0 = arith.constant 0 : i32
    %2 = arith.cmpi ne, %1, %c0_i32_0 : i32
    scf.if %2 {
      %cst_9 = arith.constant 0.000000e+00 : f32
      %12 = vector.broadcast %cst_9 : f32 to vector<128x128xf32>
      %c0_10 = arith.constant 0 : index
      %c0_11 = arith.constant 0 : index
      %13 = vector.load %arg6[%c0_10, %c0_11] : memref<128x128xf32, #tpu.memory_space<vmem>>, vector<128x128xf32>
      tpu.vector_store %arg6[%c0_10, %c0_11], %12 {strides = array<i32>} : memref<128x128xf32, #tpu.memory_space<vmem>>, vector<128x128xf32>,
    } else {
    }
    %c0 = arith.constant 0 : index
    %c0_1 = arith.constant 0 : index
    %3 = vector.load %arg6[%c0, %c0_1] : memref<128x128xf32, #tpu.memory_space<vmem>>, vector<128x128xf32>
    %c0_2 = arith.constant 0 : index
    %c0_3 = arith.constant 0 : index
    %4 = vector.load %arg2[%c0_2, %c0_3] : memref<128x128xbf16, #tpu.memory_space<vmem>>, vector<128x128xbf16>
    %c0_4 = arith.constant 0 : index
    %c0_5 = arith.constant 0 : index
    %5 = vector.load %arg3[%c0_4, %c0_5] : memref<128x128xbf16, #tpu.memory_space<vmem>>, vector<128x128xbf16>
    %cst = arith.constant dense<0.000000e+00> : vector<128x128xf32>
    %6 = tpu.matmul %4, %5, %cst {dimension_numbers = #tpu.dot_dimension_numbers<[1], [0], [0], [1], [0, 0, 1, 1], [], []>} : vector<128x128xbf16>, vector<128x128xbf16>, vector<128x128xf32> -> vector<128x128xf32>
    %7 = arith.addf %3, %6 : vector<128x128xf32>
    %c0_6 = arith.constant 0 : index
    %c0_7 = arith.constant 0 : index
    %8 = vector.load %arg6[%c0_6, %c0_7] : memref<128x128xf32, #tpu.memory_space<vmem>>, vector<128x128xf32>
    tpu.vector_store %arg6[%c0_6, %c0_7], %7 {strides = array<i32>} : memref<128x128xf32, #tpu.memory_space<vmem>>, vector<128x128xf32>,
    %c1_i32 = arith.constant 1 : i32
    %9 = arith.cmpi eq, %arg1, %c1_i32 : i32
    %10 = arith.extui %9 : i1 to i32
    %c0_i32_8 = arith.constant 0 : i32
    %11 = arith.cmpi ne, %10, %c0_i32_8 : i32
    scf.if %11 {
      %c0_9 = arith.constant 0 : index
      %c0_10 = arith.constant 0 : index
      %12 = vector.load %arg6[%c0_9, %c0_10] : memref<128x128xf32, #tpu.memory_space<vmem>>, vector<128x128xf32>
      %c0_11 = arith.constant 0 : index
      %c0_12 = arith.constant 0 : index
      %13 = vector.load %arg4[%c0_11, %c0_12] : memref<1x128xf32, #tpu.memory_space<vmem>>, vector<1x128xf32>
      %14 = vector.broadcast %13 : vector<1x128xf32> to vector<128x128xf32>
      %15 = arith.addf %12, %14 : vector<128x128xf32>
      %c0_13 = arith.constant 0 : index
      %c0_14 = arith.constant 0 : index
      %16 = vector.load %arg5[%c0_13, %c0_14] : memref<128x128xf32, #tpu.memory_space<vmem>>, vector<128x128xf32>
      tpu.vector_store %arg5[%c0_13, %c0_14], %15 {strides = array<i32>} : memref<128x128xf32, #tpu.memory_space<vmem>>, vector<128x128xf32>,
    } else {
    }
    return
  }
  func.func @transform_0(%arg0: i32, %arg1: i32) -> (i32, i32) {
    %c0_i32 = arith.constant 0 : i32
    return %arg0, %arg1 : i32, i32
  }
  func.func @transform_1(%arg0: i32, %arg1: i32) -> (i32, i32) {
    %c0_i32 = arith.constant 0 : i32
    %c0_i32_0 = arith.constant 0 : i32
    return %arg1, %c0_i32 : i32, i32
  }
  func.func @transform_2(%arg0: i32, %arg1: i32) -> (i32, i32) {
    %c0_i32 = arith.constant 0 : i32
    %c0_i32_0 = arith.constant 0 : i32
    %c0_i32_1 = arith.constant 0 : i32
    return %c0_i32, %c0_i32_0 : i32, i32
  }
  func.func @transform_3(%arg0: i32, %arg1: i32) -> (i32, i32) {
    %c0_i32 = arith.constant 0 : i32
    %c0_i32_0 = arith.constant 0 : i32
    return %arg0, %c0_i32 : i32, i32
  }
}

</mosaic_0001>

<bundles_post_ra>
// kernel: variational_gcn_encoder.3
= control target key start
LH: loop header
LB: loop body
LE: loop exit
PB: predicated region body
PF: predicated region fallthrough
CT: control target
= control target key end

     0   :  { %s605_s9 = smov 0   ;;  %s653_s0 = inlined_call_operand.vmem [shape: bf16[256,128], index: 0, kind: input, shape index: {}]   ;;  %s654_s1 = inlined_call_operand.vmem [shape: bf16[128,128], index: 1, kind: input, shape index: {}]   ;;  %s655_s2 = inlined_call_operand.vmem [shape: bf16[256,128], index: 2, kind: output, shape index: {}]  }
   0x1 LB: > { %s412_s10 = sadd.s32 4294967295, %s588_s9   ;;  %p416_p0 = scmp.ge.s32.totalorder %s588_s9, 1  ;;  %s588_s9 = sphi %s605_s9, %s12_s9  }
   0x2   : > { %p113_p1 = scmp.lt.s32.totalorder %s588_s9, 3 }
   0x4   : > { %p114_p2 = pnand %p416_p0, %p113_p1 }
   0x5   : > { %s417_s19 = sshll.u32 (!%p114_p2), %s412_s10, 4 }
   0x6   : > { %117 = sbr.rel (%p114_p2) target bundleno = 204 (0xcc), region = 28  ;;  %p136_p3 = scmp.lt.s32.totalorder (!%p114_p2), %s417_s19, 31 }
   0xb   : > { %v502_v0 = vld [vmem:[%s654_s1 + $0x38] sm:$0xff]  ;;  %v501_v1 = vld [vmem:[%s654_s1 + $0x30] sm:$0xff]  ;;  %v500_v2 = vld [vmem:[%s654_s1 + $0x28] sm:$0xff]  ;;  %s657_s19 = smov (!%p136_p3, %s417_s19), 31 }
   0xc   : > { %275 = vmatpush.bf16.msra.mxu0 %v502_v0  ;;  %550 = vmatpush.bf16.msra.mxu1 %v502_v0  ;;  %v499_v3 = vld [vmem:[%s654_s1 + $0x20] sm:$0xff]  ;;  %v498_v4 = vld [vmem:[%s654_s1 + $0x18] sm:$0xff]  ;;  %v497_v5 = vld [vmem:[%s654_s1 + $0x10] sm:$0xff]  ;;  %s418_s26 = sshll.u32 %s657_s19, 2 }
   0xd   : > { %551 = vmatpush.bf16.msra.mxu2 %v502_v0  ;;  %552 = vmatpush.bf16.msra.mxu3 %v502_v0  ;;  %v496_v6 = vld [vmem:[%s654_s1 + $0x8] sm:$0xff]  ;;  %v495_v7 = vld [vmem:[%s654_s1] sm:$0xff]  ;;  %s139_s3 = scalar_lea.vmem %s653_s0, %s418_s26  ;;  %s145_s6 = scalar_lea.vmem %s655_s2, %s418_s26 }
   0xe   : > { %v487_v8 = vld [vmem:[%s139_s3] sm:$0xff]  ;;  %v489_v9 = vld [vmem:[%s139_s3 + $0x10] sm:$0xff]  ;;  %v488_v12 = vld [vmem:[%s139_s3 + $0x8] sm:$0xff] }
   0xf   : > { %v491_v10 = vld [vmem:[%s139_s3 + $0x20] sm:$0xff]  ;;  %v493_v11 = vld [vmem:[%s139_s3 + $0x30] sm:$0xff]  ;;  %v490_v13 = vld [vmem:[%s139_s3 + $0x18] sm:$0xff] }
  0x10   : > { %276 = vmatpush.bf16.msra.mxu0 %v501_v1  ;;  %553 = vmatpush.bf16.msra.mxu1 %v501_v1  ;;  %v492_v14 = vld [vmem:[%s139_s3 + $0x28] sm:$0xff]  ;;  %v494_v15 = vld [vmem:[%s139_s3 + $0x38] sm:$0xff] }
  0x11   : > { %554 = vmatpush.bf16.msra.mxu2 %v501_v1  ;;  %555 = vmatpush.bf16.msra.mxu3 %v501_v1 }
  0x14   : > { %277 = vmatpush.bf16.msra.mxu0 %v500_v2  ;;  %556 = vmatpush.bf16.msra.mxu1 %v500_v2 }
  0x15   : > { %557 = vmatpush.bf16.msra.mxu2 %v500_v2  ;;  %558 = vmatpush.bf16.msra.mxu3 %v500_v2 }
  0x18   : > { %278 = vmatpush.bf16.msra.mxu0 %v499_v3  ;;  %559 = vmatpush.bf16.msra.mxu1 %v499_v3 }
  0x19   : > { %560 = vmatpush.bf16.msra.mxu2 %v499_v3  ;;  %561 = vmatpush.bf16.msra.mxu3 %v499_v3 }
  0x1c   : > { %279 = vmatpush.bf16.msra.mxu0 %v498_v4  ;;  %562 = vmatpush.bf16.msra.mxu1 %v498_v4 }
  0x1d   : > { %563 = vmatpush.bf16.msra.mxu2 %v498_v4  ;;  %564 = vmatpush.bf16.msra.mxu3 %v498_v4 }
  0x20   : > { %280 = vmatpush.bf16.msra.mxu0 %v497_v5  ;;  %565 = vmatpush.bf16.msra.mxu1 %v497_v5 }
  0x21   : > { %566 = vmatpush.bf16.msra.mxu2 %v497_v5  ;;  %567 = vmatpush.bf16.msra.mxu3 %v497_v5 }
  0x24   : > { %281 = vmatpush.bf16.msra.mxu0 %v496_v6  ;;  %568 = vmatpush.bf16.msra.mxu1 %v496_v6 }
  0x25   : > { %569 = vmatpush.bf16.msra.mxu2 %v496_v6  ;;  %570 = vmatpush.bf16.msra.mxu3 %v496_v6 }
  0x28   : > { %282 = vmatpush.bf16.msra.mxu0 %v495_v7  ;;  %571 = vmatpush.bf16.msra.mxu1 %v495_v7 }
  0x29   : > { %572 = vmatpush.bf16.msra.mxu2 %v495_v7  ;;  %573 = vmatpush.bf16.msra.mxu3 %v495_v7 }
  0x2b   : > { %283 = vmatmul.bf16.vlgmr.msra.gmra.mxu0 %v487_v8  ;;  %293 = vmatmul.bf16.vlgmr.msra.gmra.mxu1 %v489_v9 }
  0x2c   : > { %303 = vmatmul.bf16.vlgmr.msra.gmra.mxu2 %v491_v10  ;;  %313 = vmatmul.bf16.vlgmr.msra.gmra.mxu3 %v493_v11 }
  0x3b   : > { %288 = vmatmul.bf16.gmra.mxu0 %v488_v12  ;;  %298 = vmatmul.bf16.gmra.mxu1 %v490_v13 }
  0x3c   : > { %308 = vmatmul.bf16.gmra.mxu2 %v492_v14  ;;  %318 = vmatmul.bf16.gmra.mxu3 %v494_v15 }
  0xa8   : > { %v284_v16 = vpop.f32.mrf.mxu0  ;;  %v294_v17 = vpop.f32.mrf.mxu1 }
  0xaf   : > { %v304_v18 = vpop.f32.mrf.mxu2  ;;  %v314_v19 = vpop.f32.mrf.mxu3 }
  0xb0   : > { %v286_v20 = vpop.f32.mrf.mxu0  ;;  %v296_v21 = vpop.f32.mrf.mxu1 }
  0xb1   : > { %v506_v22 = vpack.c.bf16 %v286_v20, %v284_v16  ;;  %v516_v23 = vpack.c.bf16 %v296_v21, %v294_v17 }
  0xb3   : > { %507 = vst [vmem:[%s145_s6] sm:$0xff] %v506_v22  }
  0xb4   : > { %544 = vst [vmem:[%s145_s6 + $0x10] sm:$0xff] %v516_v23  }
  0xb7   : > { %v306_v24 = vpop.f32.mrf.mxu2  ;;  %v316_v25 = vpop.f32.mrf.mxu3 }
  0xb8   : > { %v526_v26 = vpack.c.bf16 %v306_v24, %v304_v18  ;;  %v536_v27 = vpack.c.bf16 %v316_v25, %v314_v19  ;;  %v289_v28 = vpop.f32.mrf.mxu0  ;;  %v299_v29 = vpop.f32.mrf.mxu1 }
  0xba   : > { %546 = vst [vmem:[%s145_s6 + $0x20] sm:$0xff] %v526_v26  }
  0xbb   : > { %548 = vst [vmem:[%s145_s6 + $0x30] sm:$0xff] %v536_v27  }
  0xbf   : > { %v309_v30 = vpop.f32.mrf.mxu2  ;;  %v319_v31 = vpop.f32.mrf.mxu3 }
  0xc0   : > { %v291_v32 = vpop.f32.mrf.mxu0  ;;  %v301_v33 = vpop.f32.mrf.mxu1 }
  0xc1   : > { %v511_v34 = vpack.c.bf16 %v291_v32, %v289_v28  ;;  %v521_v35 = vpack.c.bf16 %v301_v33, %v299_v29 }
  0xc3   : > { %543 = vst [vmem:[%s145_s6 + $0x8] sm:$0xff] %v511_v34  }
  0xc4   : > { %545 = vst [vmem:[%s145_s6 + $0x18] sm:$0xff] %v521_v35  }
  0xc7   : > { %v311_v36 = vpop.f32.mrf.mxu2  ;;  %v321_v37 = vpop.f32.mrf.mxu3 }
  0xc8   : > { %v531_v38 = vpack.c.bf16 %v311_v36, %v309_v30  ;;  %v541_v39 = vpack.c.bf16 %v321_v37, %v319_v31 }
  0xca   : > { %547 = vst [vmem:[%s145_s6 + $0x28] sm:$0xff] %v531_v38  }
  0xcb   : > { %549 = vst [vmem:[%s145_s6 + $0x38] sm:$0xff] %v541_v39  }
  0xcc PF: > { %s12_s9 = sadd.s32 1, %s588_s9  }
  0xcd   : > { %p9_p4 = scmp.ge.s32.totalorder %s12_s9, 4  }
  0xcf   :  { %11 = sbr.rel (!%p9_p4) target bundleno = 1 (0x1), region = 58 }

// kernel: variational_gcn_encoder.5
= control target key start
LH: loop header
LB: loop body
LE: loop exit
PB: predicated region body
PF: predicated region fallthrough
CT: control target
= control target key end

     0   :  { %s962_s12 = smov 0   ;;  %s964_s13 = smov 0   ;;  %s1115_s0 = inlined_call_operand.vmem [shape: bf16[256,256], index: 0, kind: input, shape index: {}]   ;;  %s1116_s1 = inlined_call_operand.vmem [shape: bf16[256,128], index: 1, kind: input, shape index: {}]   ;;  %s1117_s2 = inlined_call_operand.vmem [shape: f32[1,128], index: 2, kind: input, shape index: {}]   ;;  %s1118_s3 = inlined_call_operand.vmem [shape: f32[256,128], index: 3, kind: output, shape index: {}]  }
   0x1   :  { %s966_s14 = smov 0   ;;  %s968_s15 = smov 0  }
   0x2   :  { %s970_s16 = smov 0   ;;  %s972_s17 = smov 0  }
   0x3   :  { %s974_s18 = smov 0  }
   0x4 LB: > { %s22_s19 = sadd.s32 1, %s931_s16  ;;  %s25_s20 = sadd.s32 1, %s935_s17  ;;  %s939_s18 = sphi %s974_s18, %s13_s18   ;;  %s935_s17 = sphi %s972_s17, %s1124_s17   ;;  %s931_s16 = sphi %s970_s16, %s1123_s16   ;;  %s927_s15 = sphi %s968_s15, %s1122_s15   ;;  %s923_s14 = sphi %s966_s14, %s1121_s14   ;;  %s919_s13 = sphi %s964_s13, %s1120_s13   ;;  %s915_s12 = sphi %s962_s12, %s1119_s12  }
   0x5   : > { %p23_p0 = scmp.ge.s32.totalorder %s22_s19, 2  ;;  %p41_p1 = scmp.ne.s32.totalorder %s919_s13, %s915_s12 }
   0x6   : > { %p42_p2 = scmp.eq.s32.totalorder %s939_s18, 0  ;;  %s34_s24 = sadd.s32 1, %s919_s13 }
   0x7   : > { %s1126_s19 = smov (%p23_p0, %s22_s19), 0  ;;  %s1128_s20 = smov (!%p23_p0, %s25_s20), %s935_s17 }
   0x8   : > { %p43_p3 = por %p42_p2, %p41_p1  ;;  %p27_p4 = scmp.ge.s32.totalorder %s1128_s20, 2 }
   0x9   : > { %s30_s21 = ssub.s32 %s931_s16, %s1126_s19  ;;  %p707_p6 = scmp.ge.s32.totalorder %s939_s18, 4 }
   0xa   : > { %s1130_s20 = smov (%p27_p4, %s1128_s20), 0 }
   0xb   : > { %s29_s22 = ssub.s32 %s935_s17, %s1130_s20  ;;  %143 = sbr.rel (%p707_p6) target bundleno = 38 (0x26), region = 20 }
   0xc   : > { %s31_s23 = sor.u32 %s30_s21, %s29_s22 }
   0xd   : > { %p32_p5 = scmp.eq.s32.totalorder %s31_s23, 0 }
   0xf   : > { %s1013_s25 = scalar_select %p32_p5, %s919_s13, %s34_s24  }
  0x10   : > { %146 = sbr.rel (!%p43_p3) target bundleno = 38 (0x26), region = 24  ;;  %s148_s26 = sand.u32 (%p43_p3), 1, %s919_s13  }
  0x11   : > { %s786_s27 = sshll.u32 (%p43_p3), %s935_s17, 5  ;;  %s708_s28 = sshll.u32 (%p43_p3), %s148_s26, 6 }
  0x12   : > { %s153_s29 = sadd.s32 (%p43_p3), %s931_s16, %s786_s27  ;;  %s150_s7 = scalar_lea.vmem (%p43_p3), [#allocation3], %s708_s28 }
  0x13   : > { %s711_s30 = sshll.u32 (%p43_p3), %s153_s29, 2 }
  0x14   : > { %s1022_s6 = scalar_lea.vmem (%p43_p3), %s1115_s0, %s711_s30 }
  0x15   : > { %v172_v0 = vld [vmem:[%s1022_s6] sm:$0xf]  ;;  %v174_v1 = vld [vmem:[%s1022_s6 + $0x8] sm:$0xf]  ;;  %v176_v2 = vld [vmem:[%s1022_s6 + $0x10] sm:$0xf] }
  0x16   : > { %173 = vst [vmem:[%s150_s7] sm:$0xf] %v172_v0  ;;  %v178_v3 = vld [vmem:[%s1022_s6 + $0x18] sm:$0xf]  ;;  %v180_v4 = vld [vmem:[%s1022_s6 + $0x20] sm:$0xf] }
  0x17   : > { %175 = vst [vmem:[%s150_s7 + $0x4] sm:$0xf] %v174_v1  ;;  %v182_v5 = vld [vmem:[%s1022_s6 + $0x28] sm:$0xf]  ;;  %v184_v6 = vld [vmem:[%s1022_s6 + $0x30] sm:$0xf] }
  0x18   : > { %177 = vst [vmem:[%s150_s7 + $0x8] sm:$0xf] %v176_v2  ;;  %v186_v7 = vld [vmem:[%s1022_s6 + $0x38] sm:$0xf]  ;;  %v188_v8 = vld [vmem:[%s1022_s6 + $0x40] sm:$0xf] }
  0x19   : > { %179 = vst [vmem:[%s150_s7 + $0xc] sm:$0xf] %v178_v3  ;;  %v190_v9 = vld [vmem:[%s1022_s6 + $0x48] sm:$0xf]  ;;  %v192_v10 = vld [vmem:[%s1022_s6 + $0x50] sm:$0xf] }
  0x1a   : > { %181 = vst [vmem:[%s150_s7 + $0x10] sm:$0xf] %v180_v4  ;;  %v194_v11 = vld [vmem:[%s1022_s6 + $0x58] sm:$0xf]  ;;  %v196_v12 = vld [vmem:[%s1022_s6 + $0x60] sm:$0xf] }
  0x1b   : > { %183 = vst [vmem:[%s150_s7 + $0x14] sm:$0xf] %v182_v5  ;;  %v198_v13 = vld [vmem:[%s1022_s6 + $0x68] sm:$0xf]  ;;  %v200_v14 = vld [vmem:[%s1022_s6 + $0x70] sm:$0xf] }
  0x1c   : > { %185 = vst [vmem:[%s150_s7 + $0x18] sm:$0xf] %v184_v6  ;;  %v202_v15 = vld [vmem:[%s1022_s6 + $0x78] sm:$0xf] }
  0x1d   : > { %187 = vst [vmem:[%s150_s7 + $0x1c] sm:$0xf] %v186_v7 }
  0x1e   : > { %189 = vst [vmem:[%s150_s7 + $0x20] sm:$0xf] %v188_v8 }
  0x1f   : > { %191 = vst [vmem:[%s150_s7 + $0x24] sm:$0xf] %v190_v9 }
  0x20   : > { %193 = vst [vmem:[%s150_s7 + $0x28] sm:$0xf] %v192_v10 }
  0x21   : > { %195 = vst [vmem:[%s150_s7 + $0x2c] sm:$0xf] %v194_v11 }
  0x22   : > { %197 = vst [vmem:[%s150_s7 + $0x30] sm:$0xf] %v196_v12 }
  0x23   : > { %199 = vst [vmem:[%s150_s7 + $0x34] sm:$0xf] %v198_v13 }
  0x24   : > { %201 = vst [vmem:[%s150_s7 + $0x38] sm:$0xf] %v200_v14 }
  0x25   : > { %203 = vst [vmem:[%s150_s7 + $0x3c] sm:$0xf] %v202_v15 }
  0x26 PF: > { %p712_p7 = scmp.ge.s32.totalorder %s939_s18, 1  ;;  %p267_p8 = scmp.lt.s32.totalorder %s939_s18, 5 }
  0x28   : > { %p268_p9 = pnand %p712_p7, %p267_p8 }
  0x29   : > { %s274_s8 = sand.u32 (!%p268_p9), 1, %s915_s12   ;;  %s714_s9 = sshll.u32 (!%p268_p9), %s923_s14, 4 }
  0x2a   : > { %271 = sbr.rel (%p268_p9) target bundleno = 284 (0x11c), region = 69  ;;  %s713_s10 = sshll.u32 (!%p268_p9), %s274_s8, 6 }
  0x2b   : > { %p304_p10 = scmp.lt.s32.totalorder (!%p268_p9), %s714_s9, 31  ;;  %s716_s11 = sshll.u32 (!%p268_p9), %s927_s15, 4 }
  0x2c   : > { %p310_p11 = scmp.lt.s32.totalorder (!%p268_p9), %s716_s11, 31  ;;  %s1055_s12 = scalar_lea.vmem (!%p268_p9), [#allocation3], %s713_s10 }
  0x2d   : > { %p718_p12 = scmp.ne.s32.totalorder (!%p268_p9), %s923_s14, 0 }
  0x2f   : > { %s1132_s9 = smov (!%p304_p10, %s714_s9), 31  ;;  %s1134_s11 = smov (!%p310_p11, %s716_s11), 31 }
  0x30   : > { %s715_s21 = sshll.u32 %s1132_s9, 2  ;;  %s717_s26 = sshll.u32 %s1134_s11, 3 }
  0x31   : > { %s1048_s24 = scalar_lea.vmem %s1116_s1, %s715_s21  ;;  %s1053_s29 = scalar_lea.vmem %s1118_s3, %s717_s26 }
  0x32   : > { %318 = sbr.rel (%p718_p12) target bundleno = 72 (0x48), region = 77 }
  0x37   : > { %v941_v16 = vmov 0.0  }
  0x38   : > { %319 = vst [vmem:[#allocation2 + $0x30] sm:$0xff] %v941_v16 }
  0x39   : > { %320 = vst [vmem:[#allocation2] sm:$0xff] %v941_v16 }
  0x3a   : > { %321 = vst [vmem:[#allocation2 + $0x58] sm:$0xff] %v941_v16 }
  0x3b   : > { %322 = vst [vmem:[#allocation2 + $0x18] sm:$0xff] %v941_v16 }
  0x3c   : > { %323 = vst [vmem:[#allocation2 + $0x50] sm:$0xff] %v941_v16 }
  0x3d   : > { %324 = vst [vmem:[#allocation2 + $0x68] sm:$0xff] %v941_v16 }
  0x3e   : > { %325 = vst [vmem:[#allocation2 + $0x8] sm:$0xff] %v941_v16 }
  0x3f   : > { %326 = vst [vmem:[#allocation2 + $0x48] sm:$0xff] %v941_v16 }
  0x40   : > { %327 = vst [vmem:[#allocation2 + $0x40] sm:$0xff] %v941_v16 }
  0x41   : > { %328 = vst [vmem:[#allocation2 + $0x20] sm:$0xff] %v941_v16 }
  0x42   : > { %329 = vst [vmem:[#allocation2 + $0x10] sm:$0xff] %v941_v16 }
  0x43   : > { %330 = vst [vmem:[#allocation2 + $0x38] sm:$0xff] %v941_v16 }
  0x44   : > { %331 = vst [vmem:[#allocation2 + $0x60] sm:$0xff] %v941_v16 }
  0x45   : > { %332 = vst [vmem:[#allocation2 + $0x70] sm:$0xff] %v941_v16 }
  0x46   : > { %333 = vst [vmem:[#allocation2 + $0x78] sm:$0xff] %v941_v16 }
  0x47   : > { %334 = vst [vmem:[#allocation2 + $0x28] sm:$0xff] %v941_v16 }
  0x48 PF: > { %v802_v17 = vld [vmem:[%s1048_s24 + $0x38] sm:$0xff]  ;;  %v801_v18 = vld [vmem:[%s1048_s24 + $0x30] sm:$0xff]  ;;  %v800_v19 = vld [vmem:[%s1048_s24 + $0x28] sm:$0xff]  ;;  %p783_p13 = scmp.ne.s32.totalorder %s923_s14, 1 }
  0x49   : > { %479 = vmatpush.bf16.msra.mxu0 %v802_v17  ;;  %803 = vmatpush.bf16.msra.mxu1 %v802_v17  ;;  %v799_v20 = vld [vmem:[%s1048_s24 + $0x20] sm:$0xff]  ;;  %v798_v21 = vld [vmem:[%s1048_s24 + $0x18] sm:$0xff]  ;;  %v797_v22 = vld [vmem:[%s1048_s24 + $0x10] sm:$0xff] }
  0x4a   : > { %804 = vmatpush.bf16.msra.mxu2 %v802_v17  ;;  %805 = vmatpush.bf16.msra.mxu3 %v802_v17  ;;  %v796_v23 = vld [vmem:[%s1048_s24 + $0x8] sm:$0xff]  ;;  %v795_v24 = vld [vmem:[%s1048_s24] sm:$0xff]  ;;  %v789_v26 = vld [vmem:[%s1055_s12 + $0x10] sm:$0xff] }
  0x4b   : > { %v787_v25 = vld [vmem:[%s1055_s12] sm:$0xff]  ;;  %v793_v28 = vld [vmem:[%s1055_s12 + $0x30] sm:$0xff]  ;;  %v788_v29 = vld [vmem:[%s1055_s12 + $0x8] sm:$0xff] }
  0x4c   : > { %v791_v27 = vld [vmem:[%s1055_s12 + $0x20] sm:$0xff]  ;;  %v790_v30 = vld [vmem:[%s1055_s12 + $0x18] sm:$0xff]  ;;  %v792_v31 = vld [vmem:[%s1055_s12 + $0x28] sm:$0xff] }
  0x4d   : > { %480 = vmatpush.bf16.msra.mxu0 %v801_v18  ;;  %806 = vmatpush.bf16.msra.mxu1 %v801_v18  ;;  %v794_v32 = vld [vmem:[%s1055_s12 + $0x38] sm:$0xff]  ;;  %v335_v33 = vld [vmem:[#allocation2 + $0x30] sm:$0xff]  ;;  %v343_v39 = vld [vmem:[#allocation2 + $0x40] sm:$0xff] }
  0x4e   : > { %807 = vmatpush.bf16.msra.mxu2 %v801_v18  ;;  %808 = vmatpush.bf16.msra.mxu3 %v801_v18  ;;  %v339_v34 = vld [vmem:[#allocation2 + $0x50] sm:$0xff]  ;;  %v347_v40 = vld [vmem:[#allocation2 + $0x60] sm:$0xff]  ;;  %v340_v42 = vld [vmem:[#allocation2 + $0x68] sm:$0xff] }
  0x4f   : > { %v336_v41 = vld [vmem:[#allocation2] sm:$0xff]  ;;  %v348_v52 = vld [vmem:[#allocation2 + $0x70] sm:$0xff]  ;;  %v337_v53 = vld [vmem:[#allocation2 + $0x58] sm:$0xff] }
  0x50   : > { %v344_v51 = vld [vmem:[#allocation2 + $0x20] sm:$0xff]  ;;  %v341_v54 = vld [vmem:[#allocation2 + $0x8] sm:$0xff]  ;;  %v345_v63 = vld [vmem:[#allocation2 + $0x10] sm:$0xff] }
  0x51   : > { %481 = vmatpush.bf16.msra.mxu0 %v800_v19  ;;  %809 = vmatpush.bf16.msra.mxu1 %v800_v19  ;;  %v349_v0 = vld [vmem:[#allocation2 + $0x78] sm:$0xff]  ;;  %v342_v2 = vld [vmem:[#allocation2 + $0x48] sm:$0xff] }
  0x52   : > { %810 = vmatpush.bf16.msra.mxu2 %v800_v19  ;;  %811 = vmatpush.bf16.msra.mxu3 %v800_v19  ;;  %v338_v1 = vld [vmem:[#allocation2 + $0x18] sm:$0xff]  ;;  %v350_v12 = vld [vmem:[#allocation2 + $0x28] sm:$0xff] }
  0x53   : > { %v346_v11 = vld [vmem:[#allocation2 + $0x38] sm:$0xff] }
  0x55   : > { %482 = vmatpush.bf16.msra.mxu0 %v799_v20  ;;  %812 = vmatpush.bf16.msra.mxu1 %v799_v20 }
  0x56   : > { %813 = vmatpush.bf16.msra.mxu2 %v799_v20  ;;  %814 = vmatpush.bf16.msra.mxu3 %v799_v20 }
  0x59   : > { %483 = vmatpush.bf16.msra.mxu0 %v798_v21  ;;  %815 = vmatpush.bf16.msra.mxu1 %v798_v21 }
  0x5a   : > { %816 = vmatpush.bf16.msra.mxu2 %v798_v21  ;;  %817 = vmatpush.bf16.msra.mxu3 %v798_v21 }
  0x5d   : > { %484 = vmatpush.bf16.msra.mxu0 %v797_v22  ;;  %818 = vmatpush.bf16.msra.mxu1 %v797_v22 }
  0x5e   : > { %819 = vmatpush.bf16.msra.mxu2 %v797_v22  ;;  %820 = vmatpush.bf16.msra.mxu3 %v797_v22 }
  0x61   : > { %485 = vmatpush.bf16.msra.mxu0 %v796_v23  ;;  %821 = vmatpush.bf16.msra.mxu1 %v796_v23 }
  0x62   : > { %822 = vmatpush.bf16.msra.mxu2 %v796_v23  ;;  %823 = vmatpush.bf16.msra.mxu3 %v796_v23 }
  0x65   : > { %486 = vmatpush.bf16.msra.mxu0 %v795_v24  ;;  %824 = vmatpush.bf16.msra.mxu1 %v795_v24 }
  0x66   : > { %825 = vmatpush.bf16.msra.mxu2 %v795_v24  ;;  %826 = vmatpush.bf16.msra.mxu3 %v795_v24 }
  0x68   : > { %487 = vmatmul.bf16.vlgmr.msra.gmra.mxu0 %v787_v25  ;;  %497 = vmatmul.bf16.vlgmr.msra.gmra.mxu1 %v789_v26 }
  0x69   : > { %507 = vmatmul.bf16.vlgmr.msra.gmra.mxu2 %v791_v27  ;;  %517 = vmatmul.bf16.vlgmr.msra.gmra.mxu3 %v793_v28 }
  0x78   : > { %492 = vmatmul.bf16.gmra.mxu0 %v788_v29  ;;  %502 = vmatmul.bf16.gmra.mxu1 %v790_v30 }
  0x79   : > { %512 = vmatmul.bf16.gmra.mxu2 %v792_v31  ;;  %522 = vmatmul.bf16.gmra.mxu3 %v794_v32 }
  0xe5   : > { %v488_v35 = vpop.f32.mrf.mxu0  ;;  %v498_v36 = vpop.f32.mrf.mxu1 }
  0xe6   : > { %v528_v37 = vadd.f32 %v488_v35, %v335_v33  ;;  %v532_v38 = vadd.f32 %v498_v36, %v339_v34 }
  0xe8   : > { %544 = vst [vmem:[#allocation2 + $0x30] sm:$0xff] %v528_v37 }
  0xe9   : > { %548 = vst [vmem:[#allocation2 + $0x50] sm:$0xff] %v532_v38 }
  0xec   : > { %v508_v43 = vpop.f32.mrf.mxu2  ;;  %v518_v44 = vpop.f32.mrf.mxu3 }
  0xed   : > { %v536_v45 = vadd.f32 %v508_v43, %v343_v39  ;;  %v540_v46 = vadd.f32 %v518_v44, %v347_v40  ;;  %v490_v47 = vpop.f32.mrf.mxu0  ;;  %v500_v48 = vpop.f32.mrf.mxu1 }
  0xee   : > { %v529_v49 = vadd.f32 %v490_v47, %v336_v41  ;;  %v533_v50 = vadd.f32 %v500_v48, %v340_v42 }
  0xef   : > { %552 = vst [vmem:[#allocation2 + $0x40] sm:$0xff] %v536_v45 }
  0xf0   : > { %556 = vst [vmem:[#allocation2 + $0x60] sm:$0xff] %v540_v46 }
  0xf1   : > { %545 = vst [vmem:[#allocation2] sm:$0xff] %v529_v49 }
  0xf2   : > { %549 = vst [vmem:[#allocation2 + $0x68] sm:$0xff] %v533_v50 }
  0xf4   : > { %v510_v55 = vpop.f32.mrf.mxu2  ;;  %v520_v56 = vpop.f32.mrf.mxu3 }
  0xf5   : > { %v537_v57 = vadd.f32 %v510_v55, %v344_v51  ;;  %v541_v58 = vadd.f32 %v520_v56, %v348_v52  ;;  %v493_v59 = vpop.f32.mrf.mxu0  ;;  %v503_v60 = vpop.f32.mrf.mxu1 }
  0xf6   : > { %v530_v61 = vadd.f32 %v493_v59, %v337_v53  ;;  %v534_v62 = vadd.f32 %v503_v60, %v341_v54 }
  0xf7   : > { %553 = vst [vmem:[#allocation2 + $0x20] sm:$0xff] %v537_v57 }
  0xf8   : > { %557 = vst [vmem:[#allocation2 + $0x70] sm:$0xff] %v541_v58 }
  0xf9   : > { %546 = vst [vmem:[#allocation2 + $0x58] sm:$0xff] %v530_v61 }
  0xfa   : > { %550 = vst [vmem:[#allocation2 + $0x8] sm:$0xff] %v534_v62 }
  0xfc   : > { %v513_v3 = vpop.f32.mrf.mxu2  ;;  %v523_v4 = vpop.f32.mrf.mxu3 }
  0xfd   : > { %v538_v5 = vadd.f32 %v513_v3, %v345_v63  ;;  %v542_v6 = vadd.f32 %v523_v4, %v349_v0  ;;  %v495_v7 = vpop.f32.mrf.mxu0  ;;  %v505_v8 = vpop.f32.mrf.mxu1 }
  0xfe   : > { %v531_v9 = vadd.f32 %v495_v7, %v338_v1  ;;  %v535_v10 = vadd.f32 %v505_v8, %v342_v2 }
  0xff   : > { %554 = vst [vmem:[#allocation2 + $0x10] sm:$0xff] %v538_v5 }
 0x100   : > { %558 = vst [vmem:[#allocation2 + $0x78] sm:$0xff] %v542_v6 }
 0x101   : > { %547 = vst [vmem:[#allocation2 + $0x18] sm:$0xff] %v531_v9 }
 0x102   : > { %551 = vst [vmem:[#allocation2 + $0x48] sm:$0xff] %v535_v10 }
 0x104   : > { %v515_v13 = vpop.f32.mrf.mxu2  ;;  %v525_v14 = vpop.f32.mrf.mxu3  ;;  %563 = sbr.rel (%p783_p13) target bundleno = 284 (0x11c), region = 81 }
 0x105   : > { %v539_v15 = vadd.f32 %v515_v13, %v346_v11  ;;  %v543_v16 = vadd.f32 %v525_v14, %v350_v12 }
 0x107   : > { %555 = vst [vmem:[#allocation2 + $0x38] sm:$0xff] %v539_v15 }
 0x108   : > { %559 = vst [vmem:[#allocation2 + $0x28] sm:$0xff] %v543_v16 }
 0x109   : > { %v564_v17 = vld [vmem:[#allocation2 + $0x30] sm:$0xff]  ;;  %v884_v18 = vld [vmem:[%s1117_s2] ss:$0 sm:$0xff]  ;;  %v566_v20 = vld [vmem:[#allocation2 + $0x58] sm:$0xff] }
 0x10a   : > { %v565_v19 = vld [vmem:[#allocation2] sm:$0xff]  ;;  %v567_v21 = vld [vmem:[#allocation2 + $0x18] sm:$0xff]  ;;  %v584_v22 = vadd.f32 %v884_v18, %v564_v17  ;;  %v586_v24 = vadd.f32 %v884_v18, %v566_v20  ;;  %v568_v25 = vld [vmem:[#allocation2 + $0x50] sm:$0xff] }
 0x10b   : > { %v585_v23 = vadd.f32 %v884_v18, %v565_v19  ;;  %v569_v26 = vld [vmem:[#allocation2 + $0x68] sm:$0xff]  ;;  %v587_v27 = vadd.f32 %v884_v18, %v567_v21  ;;  %v588_v29 = vadd.f32 %v884_v18, %v568_v25  ;;  %v572_v32 = vld [vmem:[#allocation2 + $0x40] sm:$0xff]  ;;  %v574_v36 = vld [vmem:[#allocation2 + $0x10] sm:$0xff] }
 0x10c   : > { %v570_v28 = vld [vmem:[#allocation2 + $0x8] sm:$0xff]  ;;  %600 = vst [vmem:[%s1053_s29] sm:$0xff] %v584_v22  ;;  %v589_v31 = vadd.f32 %v884_v18, %v569_v26  ;;  %v573_v34 = vld [vmem:[#allocation2 + $0x20] sm:$0xff]  ;;  %v592_v37 = vadd.f32 %v884_v18, %v572_v32  ;;  %v594_v41 = vadd.f32 %v884_v18, %v574_v36  ;;  %v577_v42 = vld [vmem:[#allocation2 + $0x70] sm:$0xff] }
 0x10d   : > { %v571_v30 = vld [vmem:[#allocation2 + $0x48] sm:$0xff]  ;;  %601 = vst [vmem:[%s1053_s29 + $0x8] sm:$0xff] %v585_v23  ;;  %v590_v33 = vadd.f32 %v884_v18, %v570_v28  ;;  %v593_v39 = vadd.f32 %v884_v18, %v573_v34  ;;  %v576_v40 = vld [vmem:[#allocation2 + $0x60] sm:$0xff]  ;;  %v578_v44 = vld [vmem:[#allocation2 + $0x78] sm:$0xff]  ;;  %v597_v47 = vadd.f32 %v884_v18, %v577_v42 }
 0x10e   : > { %602 = vst [vmem:[%s1053_s29 + $0x10] sm:$0xff] %v586_v24  ;;  %v591_v35 = vadd.f32 %v884_v18, %v571_v30  ;;  %v575_v38 = vld [vmem:[#allocation2 + $0x38] sm:$0xff]  ;;  %v596_v45 = vadd.f32 %v884_v18, %v576_v40  ;;  %v598_v48 = vadd.f32 %v884_v18, %v578_v44 }
 0x10f   : > { %603 = vst [vmem:[%s1053_s29 + $0x18] sm:$0xff] %v587_v27  ;;  %v595_v43 = vadd.f32 %v884_v18, %v575_v38  ;;  %v579_v46 = vld [vmem:[#allocation2 + $0x28] sm:$0xff] }
 0x110   : > { %604 = vst [vmem:[%s1053_s29 + $0x20] sm:$0xff] %v588_v29  ;;  %v599_v49 = vadd.f32 %v884_v18, %v579_v46 }
 0x111   : > { %605 = vst [vmem:[%s1053_s29 + $0x28] sm:$0xff] %v589_v31 }
 0x112   : > { %606 = vst [vmem:[%s1053_s29 + $0x30] sm:$0xff] %v590_v33 }
 0x113   : > { %607 = vst [vmem:[%s1053_s29 + $0x38] sm:$0xff] %v591_v35 }
 0x114   : > { %608 = vst [vmem:[%s1053_s29 + $0x40] sm:$0xff] %v592_v37 }
 0x115   : > { %609 = vst [vmem:[%s1053_s29 + $0x48] sm:$0xff] %v593_v39 }
 0x116   : > { %610 = vst [vmem:[%s1053_s29 + $0x50] sm:$0xff] %v594_v41 }
 0x117   : > { %611 = vst [vmem:[%s1053_s29 + $0x58] sm:$0xff] %v595_v43 }
 0x118   : > { %612 = vst [vmem:[%s1053_s29 + $0x60] sm:$0xff] %v596_v45 }
 0x119   : > { %613 = vst [vmem:[%s1053_s29 + $0x68] sm:$0xff] %v597_v47 }
 0x11a   : > { %614 = vst [vmem:[%s1053_s29 + $0x70] sm:$0xff] %v598_v48 }
 0x11b   : > { %615 = vst [vmem:[%s1053_s29 + $0x78] sm:$0xff] %v599_v49 }
 0x11c PF: > { %s13_s18 = sadd.s32 1, %s939_s18   ;;  %s1119_s12 = smov %s919_s13 }
 0x11d   : > { %p10_p0 = scmp.ge.s32.totalorder %s13_s18, 6   ;;  %s1120_s13 = smov %s1013_s25 }
 0x11e   : > { %s1121_s14 = smov %s931_s16  ;;  %s1122_s15 = smov %s935_s17 }
 0x11f   : > { %s1123_s16 = smov %s1126_s19  ;;  %s1124_s17 = smov %s1130_s20 }
 0x120   :  { %12 = sbr.rel (!%p10_p0) target bundleno = 4 (0x4), region = 119 }

// kernel: variational_gcn_encoder.4
= control target key start
LH: loop header
LB: loop body
LE: loop exit
PB: predicated region body
PF: predicated region fallthrough
CT: control target
= control target key end

     0   :  { %s1258_s15 = smov 0   ;;  %s1260_s16 = smov 0   ;;  %s1445_s0 = inlined_call_operand.vmem [shape: bf16[256,256], index: 0, kind: input, shape index: {}]   ;;  %s1446_s1 = inlined_call_operand.vmem [shape: bf16[256,128], index: 1, kind: input, shape index: {}]   ;;  %s1447_s2 = inlined_call_operand.vmem [shape: f32[1,128], index: 2, kind: input, shape index: {}]   ;;  %s1448_s3 = inlined_call_operand.vmem [shape: bf16[128,128], index: 3, kind: input, shape index: {}]   ;;  %s1449_s4 = inlined_call_operand.vmem [shape: bf16[256,128], index: 4, kind: output, shape index: {}]  }
   0x1   :  { %s1262_s17 = smov 0   ;;  %s1264_s18 = smov 0  }
   0x2   :  { %s1266_s19 = smov 0   ;;  %s1268_s20 = smov 0  }
   0x3   :  { %s1270_s21 = smov 0  }
   0x4 LB: > { %s23_s22 = sadd.s32 1, %s1222_s19  ;;  %s26_s23 = sadd.s32 1, %s1226_s20  ;;  %s1230_s21 = sphi %s1270_s21, %s14_s21   ;;  %s1226_s20 = sphi %s1268_s20, %s1455_s20   ;;  %s1222_s19 = sphi %s1266_s19, %s1454_s19   ;;  %s1218_s18 = sphi %s1264_s18, %s1453_s18   ;;  %s1214_s17 = sphi %s1262_s17, %s1452_s17   ;;  %s1210_s16 = sphi %s1260_s16, %s1451_s16   ;;  %s1206_s15 = sphi %s1258_s15, %s1450_s15  }
   0x5   : > { %p24_p0 = scmp.ge.s32.totalorder %s23_s22, 2  ;;  %p42_p1 = scmp.ne.s32.totalorder %s1210_s16, %s1206_s15 }
   0x6   : > { %p43_p2 = scmp.eq.s32.totalorder %s1230_s21, 0  ;;  %s35_s27 = sadd.s32 1, %s1210_s16 }
   0x7   : > { %s1457_s22 = smov (%p24_p0, %s23_s22), 0  ;;  %s1459_s23 = smov (!%p24_p0, %s26_s23), %s1226_s20 }
   0x8   : > { %p44_p3 = por %p43_p2, %p42_p1  ;;  %p28_p4 = scmp.ge.s32.totalorder %s1459_s23, 2 }
   0x9   : > { %s31_s24 = ssub.s32 %s1222_s19, %s1457_s22  ;;  %p887_p6 = scmp.ge.s32.totalorder %s1230_s21, 4 }
   0xa   : > { %s1461_s23 = smov (%p28_p4, %s1459_s23), 0 }
   0xb   : > { %s30_s25 = ssub.s32 %s1226_s20, %s1461_s23  ;;  %168 = sbr.rel (%p887_p6) target bundleno = 38 (0x26), region = 24 }
   0xc   : > { %s32_s26 = sor.u32 %s31_s24, %s30_s25 }
   0xd   : > { %p33_p5 = scmp.eq.s32.totalorder %s32_s26, 0 }
   0xf   : > { %s1309_s28 = scalar_select %p33_p5, %s1210_s16, %s35_s27  }
  0x10   : > { %171 = sbr.rel (!%p44_p3) target bundleno = 38 (0x26), region = 28  ;;  %s173_s29 = sand.u32 (%p44_p3), 1, %s1210_s16  }
  0x11   : > { %s998_s30 = sshll.u32 (%p44_p3), %s1226_s20, 5  ;;  %s888_s5 = sshll.u32 (%p44_p3), %s173_s29, 6 }
  0x12   : > { %s178_s6 = sadd.s32 (%p44_p3), %s1222_s19, %s998_s30  ;;  %s175_s11 = scalar_lea.vmem (%p44_p3), [#allocation3], %s888_s5 }
  0x13   : > { %s891_s7 = sshll.u32 (%p44_p3), %s178_s6, 2 }
  0x14   : > { %s1318_s10 = scalar_lea.vmem (%p44_p3), %s1445_s0, %s891_s7 }
  0x15   : > { %v197_v0 = vld [vmem:[%s1318_s10] sm:$0xf]  ;;  %v199_v1 = vld [vmem:[%s1318_s10 + $0x8] sm:$0xf]  ;;  %v201_v2 = vld [vmem:[%s1318_s10 + $0x10] sm:$0xf] }
  0x16   : > { %198 = vst [vmem:[%s175_s11] sm:$0xf] %v197_v0  ;;  %v203_v3 = vld [vmem:[%s1318_s10 + $0x18] sm:$0xf]  ;;  %v205_v4 = vld [vmem:[%s1318_s10 + $0x20] sm:$0xf] }
  0x17   : > { %200 = vst [vmem:[%s175_s11 + $0x4] sm:$0xf] %v199_v1  ;;  %v207_v5 = vld [vmem:[%s1318_s10 + $0x28] sm:$0xf]  ;;  %v209_v6 = vld [vmem:[%s1318_s10 + $0x30] sm:$0xf] }
  0x18   : > { %202 = vst [vmem:[%s175_s11 + $0x8] sm:$0xf] %v201_v2  ;;  %v211_v7 = vld [vmem:[%s1318_s10 + $0x38] sm:$0xf]  ;;  %v213_v8 = vld [vmem:[%s1318_s10 + $0x40] sm:$0xf] }
  0x19   : > { %204 = vst [vmem:[%s175_s11 + $0xc] sm:$0xf] %v203_v3  ;;  %v215_v9 = vld [vmem:[%s1318_s10 + $0x48] sm:$0xf]  ;;  %v217_v10 = vld [vmem:[%s1318_s10 + $0x50] sm:$0xf] }
  0x1a   : > { %206 = vst [vmem:[%s175_s11 + $0x10] sm:$0xf] %v205_v4  ;;  %v219_v11 = vld [vmem:[%s1318_s10 + $0x58] sm:$0xf]  ;;  %v221_v12 = vld [vmem:[%s1318_s10 + $0x60] sm:$0xf] }
  0x1b   : > { %208 = vst [vmem:[%s175_s11 + $0x14] sm:$0xf] %v207_v5  ;;  %v223_v13 = vld [vmem:[%s1318_s10 + $0x68] sm:$0xf]  ;;  %v225_v14 = vld [vmem:[%s1318_s10 + $0x70] sm:$0xf] }
  0x1c   : > { %210 = vst [vmem:[%s175_s11 + $0x18] sm:$0xf] %v209_v6  ;;  %v227_v15 = vld [vmem:[%s1318_s10 + $0x78] sm:$0xf] }
  0x1d   : > { %212 = vst [vmem:[%s175_s11 + $0x1c] sm:$0xf] %v211_v7 }
  0x1e   : > { %214 = vst [vmem:[%s175_s11 + $0x20] sm:$0xf] %v213_v8 }
  0x1f   : > { %216 = vst [vmem:[%s175_s11 + $0x24] sm:$0xf] %v215_v9 }
  0x20   : > { %218 = vst [vmem:[%s175_s11 + $0x28] sm:$0xf] %v217_v10 }
  0x21   : > { %220 = vst [vmem:[%s175_s11 + $0x2c] sm:$0xf] %v219_v11 }
  0x22   : > { %222 = vst [vmem:[%s175_s11 + $0x30] sm:$0xf] %v221_v12 }
  0x23   : > { %224 = vst [vmem:[%s175_s11 + $0x34] sm:$0xf] %v223_v13 }
  0x24   : > { %226 = vst [vmem:[%s175_s11 + $0x38] sm:$0xf] %v225_v14 }
  0x25   : > { %228 = vst [vmem:[%s175_s11 + $0x3c] sm:$0xf] %v227_v15 }
  0x26 PF: > { %p892_p7 = scmp.ge.s32.totalorder %s1230_s21, 1  ;;  %p292_p8 = scmp.lt.s32.totalorder %s1230_s21, 5 }
  0x28   : > { %p293_p9 = pnand %p892_p7, %p292_p8 }
  0x29   : > { %s299_s12 = sand.u32 (!%p293_p9), 1, %s1206_s15   ;;  %s894_s13 = sshll.u32 (!%p293_p9), %s1214_s17, 4 }
  0x2a   : > { %296 = sbr.rel (%p293_p9) target bundleno = 458 (0x1ca), region = 73  ;;  %s893_s14 = sshll.u32 (!%p293_p9), %s299_s12, 6 }
  0x2b   : > { %p331_p10 = scmp.lt.s32.totalorder (!%p293_p9), %s894_s13, 31  ;;  %s896_s24 = sshll.u32 (!%p293_p9), %s1218_s18, 4 }
  0x2c   : > { %p337_p11 = scmp.lt.s32.totalorder (!%p293_p9), %s896_s24, 31  ;;  %s1351_s15 = scalar_lea.vmem (!%p293_p9), [#allocation3], %s893_s14 }
  0x2d   : > { %p898_p12 = scmp.ne.s32.totalorder (!%p293_p9), %s1214_s17, 0 }
  0x2f   : > { %s1463_s13 = smov (!%p331_p10, %s894_s13), 31  ;;  %s1465_s24 = smov (!%p337_p11, %s896_s24), 31 }
  0x30   : > { %s895_s25 = sshll.u32 %s1463_s13, 2  ;;  %s897_s30 = sshll.u32 %s1465_s24, 2 }
  0x31   : > { %s1344_s29 = scalar_lea.vmem %s1446_s1, %s895_s25  ;;  %s1349_s7 = scalar_lea.vmem %s1449_s4, %s897_s30 }
  0x32   : > { %345 = sbr.rel (%p898_p12) target bundleno = 72 (0x48), region = 81 }
  0x37   : > { %v1232_v16 = vmov 0.0  }
  0x38   : > { %346 = vst [vmem:[#allocation2 + $0x30] sm:$0xff] %v1232_v16 }
  0x39   : > { %347 = vst [vmem:[#allocation2] sm:$0xff] %v1232_v16 }
  0x3a   : > { %348 = vst [vmem:[#allocation2 + $0x58] sm:$0xff] %v1232_v16 }
  0x3b   : > { %349 = vst [vmem:[#allocation2 + $0x18] sm:$0xff] %v1232_v16 }
  0x3c   : > { %350 = vst [vmem:[#allocation2 + $0x50] sm:$0xff] %v1232_v16 }
  0x3d   : > { %351 = vst [vmem:[#allocation2 + $0x68] sm:$0xff] %v1232_v16 }
  0x3e   : > { %352 = vst [vmem:[#allocation2 + $0x8] sm:$0xff] %v1232_v16 }
  0x3f   : > { %353 = vst [vmem:[#allocation2 + $0x48] sm:$0xff] %v1232_v16 }
  0x40   : > { %354 = vst [vmem:[#allocation2 + $0x40] sm:$0xff] %v1232_v16 }
  0x41   : > { %355 = vst [vmem:[#allocation2 + $0x20] sm:$0xff] %v1232_v16 }
  0x42   : > { %356 = vst [vmem:[#allocation2 + $0x10] sm:$0xff] %v1232_v16 }
  0x43   : > { %357 = vst [vmem:[#allocation2 + $0x38] sm:$0xff] %v1232_v16 }
  0x44   : > { %358 = vst [vmem:[#allocation2 + $0x60] sm:$0xff] %v1232_v16 }
  0x45   : > { %359 = vst [vmem:[#allocation2 + $0x70] sm:$0xff] %v1232_v16 }
  0x46   : > { %360 = vst [vmem:[#allocation2 + $0x78] sm:$0xff] %v1232_v16 }
  0x47   : > { %361 = vst [vmem:[#allocation2 + $0x28] sm:$0xff] %v1232_v16 }
  0x48 PF: > { %v1014_v17 = vld [vmem:[%s1344_s29 + $0x38] sm:$0xff]  ;;  %v1013_v18 = vld [vmem:[%s1344_s29 + $0x30] sm:$0xff]  ;;  %v1012_v19 = vld [vmem:[%s1344_s29 + $0x28] sm:$0xff]  ;;  %p963_p13 = scmp.ne.s32.totalorder %s1214_s17, 1 }
  0x49   : > { %506 = vmatpush.bf16.msra.mxu0 %v1014_v17  ;;  %1070 = vmatpush.bf16.msra.mxu1 %v1014_v17  ;;  %v1011_v20 = vld [vmem:[%s1344_s29 + $0x20] sm:$0xff]  ;;  %v1010_v21 = vld [vmem:[%s1344_s29 + $0x18] sm:$0xff]  ;;  %v1009_v22 = vld [vmem:[%s1344_s29 + $0x10] sm:$0xff] }
  0x4a   : > { %1071 = vmatpush.bf16.msra.mxu2 %v1014_v17  ;;  %1072 = vmatpush.bf16.msra.mxu3 %v1014_v17  ;;  %v1008_v23 = vld [vmem:[%s1344_s29 + $0x8] sm:$0xff]  ;;  %v1007_v24 = vld [vmem:[%s1344_s29] sm:$0xff]  ;;  %v1001_v26 = vld [vmem:[%s1351_s15 + $0x10] sm:$0xff] }
  0x4b   : > { %v999_v25 = vld [vmem:[%s1351_s15] sm:$0xff]  ;;  %v1005_v28 = vld [vmem:[%s1351_s15 + $0x30] sm:$0xff]  ;;  %v1000_v29 = vld [vmem:[%s1351_s15 + $0x8] sm:$0xff] }
  0x4c   : > { %v1003_v27 = vld [vmem:[%s1351_s15 + $0x20] sm:$0xff]  ;;  %v1002_v30 = vld [vmem:[%s1351_s15 + $0x18] sm:$0xff]  ;;  %v1004_v31 = vld [vmem:[%s1351_s15 + $0x28] sm:$0xff] }
  0x4d   : > { %507 = vmatpush.bf16.msra.mxu0 %v1013_v18  ;;  %1073 = vmatpush.bf16.msra.mxu1 %v1013_v18  ;;  %v1006_v32 = vld [vmem:[%s1351_s15 + $0x38] sm:$0xff]  ;;  %v362_v33 = vld [vmem:[#allocation2 + $0x30] sm:$0xff]  ;;  %v370_v39 = vld [vmem:[#allocation2 + $0x40] sm:$0xff] }
  0x4e   : > { %1074 = vmatpush.bf16.msra.mxu2 %v1013_v18  ;;  %1075 = vmatpush.bf16.msra.mxu3 %v1013_v18  ;;  %v366_v34 = vld [vmem:[#allocation2 + $0x50] sm:$0xff]  ;;  %v374_v40 = vld [vmem:[#allocation2 + $0x60] sm:$0xff]  ;;  %v367_v42 = vld [vmem:[#allocation2 + $0x68] sm:$0xff] }
  0x4f   : > { %v363_v41 = vld [vmem:[#allocation2] sm:$0xff]  ;;  %v375_v52 = vld [vmem:[#allocation2 + $0x70] sm:$0xff]  ;;  %v364_v53 = vld [vmem:[#allocation2 + $0x58] sm:$0xff] }
  0x50   : > { %v371_v51 = vld [vmem:[#allocation2 + $0x20] sm:$0xff]  ;;  %v368_v54 = vld [vmem:[#allocation2 + $0x8] sm:$0xff]  ;;  %v372_v63 = vld [vmem:[#allocation2 + $0x10] sm:$0xff] }
  0x51   : > { %508 = vmatpush.bf16.msra.mxu0 %v1012_v19  ;;  %1076 = vmatpush.bf16.msra.mxu1 %v1012_v19  ;;  %v376_v0 = vld [vmem:[#allocation2 + $0x78] sm:$0xff]  ;;  %v369_v2 = vld [vmem:[#allocation2 + $0x48] sm:$0xff] }
  0x52   : > { %1077 = vmatpush.bf16.msra.mxu2 %v1012_v19  ;;  %1078 = vmatpush.bf16.msra.mxu3 %v1012_v19  ;;  %v365_v1 = vld [vmem:[#allocation2 + $0x18] sm:$0xff]  ;;  %v377_v12 = vld [vmem:[#allocation2 + $0x28] sm:$0xff] }
  0x53   : > { %v373_v11 = vld [vmem:[#allocation2 + $0x38] sm:$0xff] }
  0x55   : > { %509 = vmatpush.bf16.msra.mxu0 %v1011_v20  ;;  %1079 = vmatpush.bf16.msra.mxu1 %v1011_v20 }
  0x56   : > { %1080 = vmatpush.bf16.msra.mxu2 %v1011_v20  ;;  %1081 = vmatpush.bf16.msra.mxu3 %v1011_v20 }
  0x59   : > { %510 = vmatpush.bf16.msra.mxu0 %v1010_v21  ;;  %1082 = vmatpush.bf16.msra.mxu1 %v1010_v21 }
  0x5a   : > { %1083 = vmatpush.bf16.msra.mxu2 %v1010_v21  ;;  %1084 = vmatpush.bf16.msra.mxu3 %v1010_v21 }
  0x5d   : > { %511 = vmatpush.bf16.msra.mxu0 %v1009_v22  ;;  %1085 = vmatpush.bf16.msra.mxu1 %v1009_v22 }
  0x5e   : > { %1086 = vmatpush.bf16.msra.mxu2 %v1009_v22  ;;  %1087 = vmatpush.bf16.msra.mxu3 %v1009_v22 }
  0x61   : > { %512 = vmatpush.bf16.msra.mxu0 %v1008_v23  ;;  %1088 = vmatpush.bf16.msra.mxu1 %v1008_v23 }
  0x62   : > { %1089 = vmatpush.bf16.msra.mxu2 %v1008_v23  ;;  %1090 = vmatpush.bf16.msra.mxu3 %v1008_v23 }
  0x65   : > { %513 = vmatpush.bf16.msra.mxu0 %v1007_v24  ;;  %1091 = vmatpush.bf16.msra.mxu1 %v1007_v24 }
  0x66   : > { %1092 = vmatpush.bf16.msra.mxu2 %v1007_v24  ;;  %1093 = vmatpush.bf16.msra.mxu3 %v1007_v24 }
  0x68   : > { %514 = vmatmul.bf16.vlgmr.msra.gmra.mxu0 %v999_v25  ;;  %524 = vmatmul.bf16.vlgmr.msra.gmra.mxu1 %v1001_v26 }
  0x69   : > { %534 = vmatmul.bf16.vlgmr.msra.gmra.mxu2 %v1003_v27  ;;  %544 = vmatmul.bf16.vlgmr.msra.gmra.mxu3 %v1005_v28 }
  0x78   : > { %519 = vmatmul.bf16.gmra.mxu0 %v1000_v29  ;;  %529 = vmatmul.bf16.gmra.mxu1 %v1002_v30 }
  0x79   : > { %539 = vmatmul.bf16.gmra.mxu2 %v1004_v31  ;;  %549 = vmatmul.bf16.gmra.mxu3 %v1006_v32 }
  0xe5   : > { %v515_v35 = vpop.f32.mrf.mxu0  ;;  %v525_v36 = vpop.f32.mrf.mxu1 }
  0xe6   : > { %v555_v37 = vadd.f32 %v515_v35, %v362_v33  ;;  %v559_v38 = vadd.f32 %v525_v36, %v366_v34 }
  0xe8   : > { %571 = vst [vmem:[#allocation2 + $0x30] sm:$0xff] %v555_v37 }
  0xe9   : > { %575 = vst [vmem:[#allocation2 + $0x50] sm:$0xff] %v559_v38 }
  0xec   : > { %v535_v43 = vpop.f32.mrf.mxu2  ;;  %v545_v44 = vpop.f32.mrf.mxu3 }
  0xed   : > { %v563_v45 = vadd.f32 %v535_v43, %v370_v39  ;;  %v567_v46 = vadd.f32 %v545_v44, %v374_v40  ;;  %v517_v47 = vpop.f32.mrf.mxu0  ;;  %v527_v48 = vpop.f32.mrf.mxu1 }
  0xee   : > { %v556_v49 = vadd.f32 %v517_v47, %v363_v41  ;;  %v560_v50 = vadd.f32 %v527_v48, %v367_v42 }
  0xef   : > { %579 = vst [vmem:[#allocation2 + $0x40] sm:$0xff] %v563_v45 }
  0xf0   : > { %583 = vst [vmem:[#allocation2 + $0x60] sm:$0xff] %v567_v46 }
  0xf1   : > { %572 = vst [vmem:[#allocation2] sm:$0xff] %v556_v49 }
  0xf2   : > { %576 = vst [vmem:[#allocation2 + $0x68] sm:$0xff] %v560_v50 }
  0xf4   : > { %v537_v55 = vpop.f32.mrf.mxu2  ;;  %v547_v56 = vpop.f32.mrf.mxu3 }
  0xf5   : > { %v564_v57 = vadd.f32 %v537_v55, %v371_v51  ;;  %v568_v58 = vadd.f32 %v547_v56, %v375_v52  ;;  %v520_v59 = vpop.f32.mrf.mxu0  ;;  %v530_v60 = vpop.f32.mrf.mxu1 }
  0xf6   : > { %v557_v61 = vadd.f32 %v520_v59, %v364_v53  ;;  %v561_v62 = vadd.f32 %v530_v60, %v368_v54 }
  0xf7   : > { %580 = vst [vmem:[#allocation2 + $0x20] sm:$0xff] %v564_v57 }
  0xf8   : > { %584 = vst [vmem:[#allocation2 + $0x70] sm:$0xff] %v568_v58 }
  0xf9   : > { %573 = vst [vmem:[#allocation2 + $0x58] sm:$0xff] %v557_v61 }
  0xfa   : > { %577 = vst [vmem:[#allocation2 + $0x8] sm:$0xff] %v561_v62 }
  0xfc   : > { %v540_v3 = vpop.f32.mrf.mxu2  ;;  %v550_v4 = vpop.f32.mrf.mxu3 }
  0xfd   : > { %v565_v5 = vadd.f32 %v540_v3, %v372_v63  ;;  %v569_v6 = vadd.f32 %v550_v4, %v376_v0  ;;  %v522_v7 = vpop.f32.mrf.mxu0  ;;  %v532_v8 = vpop.f32.mrf.mxu1 }
  0xfe   : > { %v558_v9 = vadd.f32 %v522_v7, %v365_v1  ;;  %v562_v10 = vadd.f32 %v532_v8, %v369_v2 }
  0xff   : > { %581 = vst [vmem:[#allocation2 + $0x10] sm:$0xff] %v565_v5 }
 0x100   : > { %585 = vst [vmem:[#allocation2 + $0x78] sm:$0xff] %v569_v6 }
 0x101   : > { %574 = vst [vmem:[#allocation2 + $0x18] sm:$0xff] %v558_v9 }
 0x102   : > { %578 = vst [vmem:[#allocation2 + $0x48] sm:$0xff] %v562_v10 }
 0x104   : > { %v542_v13 = vpop.f32.mrf.mxu2  ;;  %v552_v14 = vpop.f32.mrf.mxu3  ;;  %590 = sbr.rel (%p963_p13) target bundleno = 458 (0x1ca), region = 85 }
 0x105   : > { %v566_v15 = vadd.f32 %v542_v13, %v373_v11  ;;  %v570_v16 = vadd.f32 %v552_v14, %v377_v12 }
 0x107   : > { %582 = vst [vmem:[#allocation2 + $0x38] sm:$0xff] %v566_v15 }
 0x108   : > { %586 = vst [vmem:[#allocation2 + $0x28] sm:$0xff] %v570_v16 }
 0x109   : > { %v1022_v17 = vld [vmem:[%s1448_s3 + $0x38] sm:$0xff]  ;;  %v1021_v18 = vld [vmem:[%s1448_s3 + $0x30] sm:$0xff]  ;;  %v1020_v19 = vld [vmem:[%s1448_s3 + $0x28] sm:$0xff] }
 0x10a   : > { %715 = vmatpush.bf16.msra.mxu0 %v1022_v17  ;;  %1094 = vmatpush.bf16.msra.mxu1 %v1022_v17  ;;  %v1019_v20 = vld [vmem:[%s1448_s3 + $0x20] sm:$0xff]  ;;  %v1018_v21 = vld [vmem:[%s1448_s3 + $0x18] sm:$0xff]  ;;  %v1017_v23 = vld [vmem:[%s1448_s3 + $0x10] sm:$0xff] }
 0x10b   : > { %1095 = vmatpush.bf16.msra.mxu2 %v1022_v17  ;;  %1096 = vmatpush.bf16.msra.mxu3 %v1022_v17  ;;  %v1389_v22 = vld [vmem:[%s1447_s2] ss:$0 sm:$0xff]  ;;  %v591_v24 = vld [vmem:[#allocation2 + $0x30] sm:$0xff]  ;;  %v596_v27 = vld [vmem:[#allocation2 + $0x68] sm:$0xff] }
 0x10c   : > { %v592_v25 = vld [vmem:[#allocation2] sm:$0xff]  ;;  %v595_v26 = vld [vmem:[#allocation2 + $0x50] sm:$0xff]  ;;  %v611_v32 = vadd.f32 %v1389_v22, %v591_v24  ;;  %v616_v35 = vadd.f32 %v1389_v22, %v596_v27  ;;  %v1016_v37 = vld [vmem:[%s1448_s3 + $0x8] sm:$0xff] }
 0x10d   : > { %v599_v28 = vld [vmem:[#allocation2 + $0x40] sm:$0xff]  ;;  %v604_v31 = vld [vmem:[#allocation2 + $0x70] sm:$0xff]  ;;  %v612_v33 = vadd.f32 %v1389_v22, %v592_v25  ;;  %v615_v34 = vadd.f32 %v1389_v22, %v595_v26  ;;  %v593_v54 = vld [vmem:[#allocation2 + $0x58] sm:$0xff] }
 0x10e   : > { %716 = vmatpush.bf16.msra.mxu0 %v1021_v18  ;;  %1097 = vmatpush.bf16.msra.mxu1 %v1021_v18  ;;  %v600_v29 = vld [vmem:[#allocation2 + $0x20] sm:$0xff]  ;;  %v619_v36 = vadd.f32 %v1389_v22, %v599_v28  ;;  %v624_v40 = vadd.f32 %v1389_v22, %v604_v31  ;;  %v627_v41 = vmax.f32 %v611_v32, 0.0  ;;  %v632_v44 = vmax.f32 %v616_v35, 0.0  ;;  %v594_v55 = vld [vmem:[#allocation2 + $0x18] sm:$0xff]  ;;  %v597_v56 = vld [vmem:[#allocation2 + $0x8] sm:$0xff] }
 0x10f   : > { %1098 = vmatpush.bf16.msra.mxu2 %v1021_v18  ;;  %1099 = vmatpush.bf16.msra.mxu3 %v1021_v18  ;;  %v603_v30 = vld [vmem:[#allocation2 + $0x60] sm:$0xff]  ;;  %v620_v38 = vadd.f32 %v1389_v22, %v600_v29  ;;  %v628_v42 = vmax.f32 %v612_v33, 0.0  ;;  %v631_v43 = vmax.f32 %v615_v34, 0.0  ;;  %v598_v57 = vld [vmem:[#allocation2 + $0x48] sm:$0xff]  ;;  %v601_v58 = vld [vmem:[#allocation2 + $0x10] sm:$0xff]  ;;  %v613_v62 = vadd.f32 %v1389_v22, %v593_v54 }
 0x110   : > { %v623_v39 = vadd.f32 %v1389_v22, %v603_v30  ;;  %v1015_v45 = vld [vmem:[%s1448_s3] sm:$0xff]  ;;  %v635_v46 = vmax.f32 %v619_v36, 0.0  ;;  %v640_v49 = vmax.f32 %v624_v40, 0.0  ;;  %v602_v59 = vld [vmem:[#allocation2 + $0x38] sm:$0xff]  ;;  %v606_v61 = vld [vmem:[#allocation2 + $0x28] sm:$0xff]  ;;  %v614_v63 = vadd.f32 %v1389_v22, %v594_v55 }
 0x111   : > { %v636_v47 = vmax.f32 %v620_v38, 0.0  ;;  %v643_v50 = vpack.c.bf16 %v628_v42, %v627_v41  ;;  %v645_v51 = vpack.c.bf16 %v632_v44, %v631_v43  ;;  %v605_v60 = vld [vmem:[#allocation2 + $0x78] sm:$0xff]  ;;  %v617_v0 = vadd.f32 %v1389_v22, %v597_v56 }
 0x112   : > { %717 = vmatpush.bf16.msra.mxu0 %v1020_v19  ;;  %1100 = vmatpush.bf16.msra.mxu1 %v1020_v19  ;;  %v639_v48 = vmax.f32 %v623_v39, 0.0  ;;  %v618_v1 = vadd.f32 %v1389_v22, %v598_v57  ;;  %v621_v2 = vadd.f32 %v1389_v22, %v601_v58  ;;  %v622_v3 = vadd.f32 %v1389_v22, %v602_v59 }
 0x113   : > { %1101 = vmatpush.bf16.msra.mxu2 %v1020_v19  ;;  %1102 = vmatpush.bf16.msra.mxu3 %v1020_v19  ;;  %v647_v52 = vpack.c.bf16 %v636_v47, %v635_v46  ;;  %v625_v4 = vadd.f32 %v1389_v22, %v605_v60  ;;  %v626_v5 = vadd.f32 %v1389_v22, %v606_v61  ;;  %v629_v6 = vmax.f32 %v613_v62, 0.0 }
 0x114   : > { %v649_v53 = vpack.c.bf16 %v640_v49, %v639_v48  ;;  %v630_v7 = vmax.f32 %v614_v63, 0.0  ;;  %v633_v8 = vmax.f32 %v617_v0, 0.0  ;;  %v634_v9 = vmax.f32 %v618_v1, 0.0 }
 0x115   : > { %v637_v10 = vmax.f32 %v621_v2, 0.0  ;;  %v638_v11 = vmax.f32 %v622_v3, 0.0  ;;  %v641_v12 = vmax.f32 %v625_v4, 0.0  ;;  %v642_v13 = vmax.f32 %v626_v5, 0.0 }
 0x116   : > { %718 = vmatpush.bf16.msra.mxu0 %v1019_v20  ;;  %1103 = vmatpush.bf16.msra.mxu1 %v1019_v20  ;;  %v644_v14 = vpack.c.bf16 %v630_v7, %v629_v6  ;;  %v646_v15 = vpack.c.bf16 %v634_v9, %v633_v8 }
 0x117   : > { %1104 = vmatpush.bf16.msra.mxu2 %v1019_v20  ;;  %1105 = vmatpush.bf16.msra.mxu3 %v1019_v20  ;;  %v648_v16 = vpack.c.bf16 %v638_v11, %v637_v10  ;;  %v650_v17 = vpack.c.bf16 %v642_v13, %v641_v12 }
 0x11a   : > { %719 = vmatpush.bf16.msra.mxu0 %v1018_v21  ;;  %1106 = vmatpush.bf16.msra.mxu1 %v1018_v21 }
 0x11b   : > { %1107 = vmatpush.bf16.msra.mxu2 %v1018_v21  ;;  %1108 = vmatpush.bf16.msra.mxu3 %v1018_v21 }
 0x11e   : > { %720 = vmatpush.bf16.msra.mxu0 %v1017_v23  ;;  %1109 = vmatpush.bf16.msra.mxu1 %v1017_v23 }
 0x11f   : > { %1110 = vmatpush.bf16.msra.mxu2 %v1017_v23  ;;  %1111 = vmatpush.bf16.msra.mxu3 %v1017_v23 }
 0x122   : > { %721 = vmatpush.bf16.msra.mxu0 %v1016_v37  ;;  %1112 = vmatpush.bf16.msra.mxu1 %v1016_v37 }
 0x123   : > { %1113 = vmatpush.bf16.msra.mxu2 %v1016_v37  ;;  %1114 = vmatpush.bf16.msra.mxu3 %v1016_v37 }
 0x126   : > { %722 = vmatpush.bf16.msra.mxu0 %v1015_v45  ;;  %1115 = vmatpush.bf16.msra.mxu1 %v1015_v45 }
 0x127   : > { %1116 = vmatpush.bf16.msra.mxu2 %v1015_v45  ;;  %1117 = vmatpush.bf16.msra.mxu3 %v1015_v45 }
 0x129   : > { %723 = vmatmul.bf16.vlgmr.msra.gmra.mxu0 %v643_v50  ;;  %733 = vmatmul.bf16.vlgmr.msra.gmra.mxu1 %v645_v51 }
 0x12a   : > { %743 = vmatmul.bf16.vlgmr.msra.gmra.mxu2 %v647_v52  ;;  %753 = vmatmul.bf16.vlgmr.msra.gmra.mxu3 %v649_v53 }
 0x139   : > { %728 = vmatmul.bf16.gmra.mxu0 %v644_v14  ;;  %738 = vmatmul.bf16.gmra.mxu1 %v646_v15 }
 0x13a   : > { %748 = vmatmul.bf16.gmra.mxu2 %v648_v16  ;;  %758 = vmatmul.bf16.gmra.mxu3 %v650_v17 }
 0x1a6   : > { %v724_v18 = vpop.f32.mrf.mxu0  ;;  %v734_v19 = vpop.f32.mrf.mxu1 }
 0x1ad   : > { %v744_v20 = vpop.f32.mrf.mxu2  ;;  %v754_v21 = vpop.f32.mrf.mxu3 }
 0x1ae   : > { %v726_v22 = vpop.f32.mrf.mxu0  ;;  %v736_v23 = vpop.f32.mrf.mxu1 }
 0x1af   : > { %v1026_v24 = vpack.c.bf16 %v726_v22, %v724_v18  ;;  %v1036_v25 = vpack.c.bf16 %v736_v23, %v734_v19 }
 0x1b1   : > { %1027 = vst [vmem:[%s1349_s7] sm:$0xff] %v1026_v24  }
 0x1b2   : > { %1064 = vst [vmem:[%s1349_s7 + $0x10] sm:$0xff] %v1036_v25  }
 0x1b5   : > { %v746_v26 = vpop.f32.mrf.mxu2  ;;  %v756_v27 = vpop.f32.mrf.mxu3 }
 0x1b6   : > { %v1046_v28 = vpack.c.bf16 %v746_v26, %v744_v20  ;;  %v1056_v29 = vpack.c.bf16 %v756_v27, %v754_v21  ;;  %v729_v30 = vpop.f32.mrf.mxu0  ;;  %v739_v31 = vpop.f32.mrf.mxu1 }
 0x1b8   : > { %1066 = vst [vmem:[%s1349_s7 + $0x20] sm:$0xff] %v1046_v28  }
 0x1b9   : > { %1068 = vst [vmem:[%s1349_s7 + $0x30] sm:$0xff] %v1056_v29  }
 0x1bd   : > { %v749_v32 = vpop.f32.mrf.mxu2  ;;  %v759_v33 = vpop.f32.mrf.mxu3 }
 0x1be   : > { %v731_v34 = vpop.f32.mrf.mxu0  ;;  %v741_v35 = vpop.f32.mrf.mxu1 }
 0x1bf   : > { %v1031_v36 = vpack.c.bf16 %v731_v34, %v729_v30  ;;  %v1041_v37 = vpack.c.bf16 %v741_v35, %v739_v31 }
 0x1c1   : > { %1063 = vst [vmem:[%s1349_s7 + $0x8] sm:$0xff] %v1031_v36  }
 0x1c2   : > { %1065 = vst [vmem:[%s1349_s7 + $0x18] sm:$0xff] %v1041_v37  }
 0x1c5   : > { %v751_v38 = vpop.f32.mrf.mxu2  ;;  %v761_v39 = vpop.f32.mrf.mxu3 }
 0x1c6   : > { %v1051_v40 = vpack.c.bf16 %v751_v38, %v749_v32  ;;  %v1061_v41 = vpack.c.bf16 %v761_v39, %v759_v33 }
 0x1c8   : > { %1067 = vst [vmem:[%s1349_s7 + $0x28] sm:$0xff] %v1051_v40  }
 0x1c9   : > { %1069 = vst [vmem:[%s1349_s7 + $0x38] sm:$0xff] %v1061_v41  }
 0x1ca PF: > { %s14_s21 = sadd.s32 1, %s1230_s21   ;;  %s1450_s15 = smov %s1210_s16 }
 0x1cb   : > { %p11_p0 = scmp.ge.s32.totalorder %s14_s21, 6   ;;  %s1451_s16 = smov %s1309_s28 }
 0x1cc   : > { %s1452_s17 = smov %s1222_s19  ;;  %s1453_s18 = smov %s1226_s20 }
 0x1cd   : > { %s1454_s19 = smov %s1457_s22  ;;  %s1455_s20 = smov %s1461_s23 }
 0x1ce   :  { %13 = sbr.rel (!%p11_p0) target bundleno = 4 (0x4), region = 123 }

</bundles_post_ra>
